<compile_context>
chip_gen: v7x
topology: tpu7x:2x2x1
jax: 0.10.0
libtpu: 0.0.40
codegen_flags: <defaults>
</compile_context>

<pallas_src>
import functools

import jax
import jax.numpy as jnp
from jax import lax
from jax.experimental import pallas as pl
from jax.experimental.pallas import tpu as pltpu

EPS = 1e-5
NEG_INF = float("-inf")

PRIMITIVES = ("none", "skip_connect", "max_pool_3", "avg_pool_3", "conv_3")
NUM_PRIM = len(PRIMITIVES)


def _bn_train(y, valid, inv_count):
    """BatchNorm1d(affine=False), training-mode stats per channel over the lane axis.

    Single-pass sum / sum-of-squares.  Padded lanes are guaranteed zero on entry, so
    the plain sums already equal the sums over valid positions; output padding is
    re-zeroed so downstream ops keep the invariant.
    """
    s1 = jnp.sum(y, axis=1, keepdims=True)
    s2 = jnp.sum(y * y, axis=1, keepdims=True)
    mean = s1 * inv_count
    var = jnp.maximum(s2 * inv_count - mean * mean, 0.0)
    inv = lax.rsqrt(var + EPS)
    return jnp.where(valid, (y - mean) * inv, 0.0)


def _cell_kernel(alpha_ref, s0_ref, s1_ref, w0_ref, w1_ref, opw_ref, o_ref,
                 *, n, length, steps, multiplier, nl_pad):
    nl_valid = n * length
    inv_count = 1.0 / float(nl_valid)

    # Lane masks (computed once, reused by every edge).
    lane = lax.broadcasted_iota(jnp.int32, (1, nl_pad), 1)
    valid = lane < nl_valid
    pos = lane % length
    has_left = valid & (pos != 0)            # position l-1 exists inside this batch item
    has_right = valid & (pos != length - 1)  # position l+1 exists inside this batch item

    def mxu_dot(w, x):
        # bf16 operands feed the MXU natively; accumulate in f32.
        return jnp.dot(w.astype(jnp.bfloat16), x.astype(jnp.bfloat16),
                       preferred_element_type=jnp.float32)

    def shift_from_left(x):   # result[:, l] = x[:, l-1]
        return pltpu.roll(x, 1, axis=1)

    def shift_from_right(x):  # result[:, l] = x[:, l+1]
        return pltpu.roll(x, nl_pad - 1, axis=1)

    def relu_conv1x1_bn(x, w):
        # ReLU -> Conv1d(k=1, bias=False) as one (Co,Ci)x(Ci,N*L) dot -> BN(affine=False)
        return _bn_train(mxu_dot(w, jnp.maximum(x, 0.0)), valid, inv_count)

    def mixed_op(x, w_conv, e):
        x_lm1 = shift_from_left(x)
        x_lp1 = shift_from_right(x)

        # max_pool(3, stride=1, pad=1) -> BatchNorm1d(affine=False); pad acts as -inf.
        mp_in = jnp.maximum(jnp.maximum(jnp.where(has_left, x_lm1, NEG_INF), x),
                            jnp.where(has_right, x_lp1, NEG_INF))
        mp = _bn_train(mp_in, valid, inv_count)

        # avg_pool(3, stride=1, pad=1, count_include_pad=True) -> BatchNorm1d(affine=False)
        ap_in = (jnp.where(has_left, x_lm1, 0.0) + x
                 + jnp.where(has_right, x_lp1, 0.0)) * (1.0 / 3.0)
        ap = _bn_train(ap_in, valid, inv_count)

        # conv_3: ReLU -> Conv1d(k=3, pad=1, bias=False) -> BN, as one (C,3C)x(3C,N*L) dot
        xr = jnp.maximum(x, 0.0)
        xr_lm1 = jnp.where(has_left, shift_from_left(xr), 0.0)
        xr_lp1 = jnp.where(has_right, shift_from_right(xr), 0.0)
        xin = jnp.concatenate([xr_lm1, xr, xr_lp1], axis=0)
        conv = _bn_train(mxu_dot(w_conv, xin), valid, inv_count)

        # Weighted mixture; alpha[0] multiplies 'none' (zeros) and is dropped.
        a_skip = alpha_ref[e, 1]
        a_mp = alpha_ref[e, 2]
        a_ap = alpha_ref[e, 3]
        a_cv = alpha_ref[e, 4]
        return a_skip * x + a_mp * mp + a_ap * ap + a_cv * conv

    # Preprocess both incoming states, then run all edges with states kept in VMEM.
    s0 = relu_conv1x1_bn(s0_ref[...], w0_ref[...])
    s1 = relu_conv1x1_bn(s1_ref[...], w1_ref[...])
    states = [s0, s1]
    offset = 0
    for _ in range(steps):
        s = None
        for j, h in enumerate(states):
            y = mixed_op(h, opw_ref[offset + j], offset + j)
            s = y if s is None else s + y
        offset += len(states)
        states.append(s)

    o_ref[...] = jnp.concatenate(states[-multiplier:], axis=0)


def _to_lane_layout(x, nl_pad):
    """(N, C, L) -> (C, N*L), zero-padded along the lane axis to nl_pad."""
    n, c, l = x.shape
    x2 = jnp.transpose(x, (1, 0, 2)).reshape(c, n * l).astype(jnp.float32)
    if nl_pad > n * l:
        x2 = jnp.pad(x2, ((0, 0), (0, nl_pad - n * l)))
    return x2


def cell_bread_encoder(s0, s1, weights_1, weights_2, params, *, steps, multiplier):
    """Forward of Cell_Bread_Encoder with reduction=False, reduction_prev=False."""
    # TODO(synk): reduction=True (MixedDown / OPS_DOWN) and reduction_prev=True
    #             (FactorizedReduce) branches are not implemented — their op tables are
    #             not part of the provided module source.
    del weights_2  # unused when reduction=False (matches the PyTorch forward)

    n, _, length = s0.shape
    c = params["pre0_w"].shape[0]
    nl = n * length
    nl_pad = ((nl + 127) // 128) * 128  # lane-dense padding

    s0_2d = _to_lane_layout(s0, nl_pad)
    s1_2d = _to_lane_layout(s1, nl_pad)

    # Conv1d weights (E, Co, Ci, K=3) -> (E, Co, 3*Ci), ordered to match the
    # [x[l-1]; x[l]; x[l+1]] row stacking used inside the kernel (host-side, once).
    w_conv = params["op_w"].astype(jnp.float32)
    num_edges = w_conv.shape[0]
    w_conv_flat = jnp.transpose(w_conv, (0, 1, 3, 2)).reshape(num_edges, c, 3 * c)

    kernel = functools.partial(_cell_kernel, n=n, length=length, steps=steps,
                               multiplier=multiplier, nl_pad=nl_pad)

    out2d = pl.pallas_call(
        kernel,
        out_shape=jax.ShapeDtypeStruct((multiplier * c, nl_pad), jnp.float32),
        in_specs=[
            pl.BlockSpec(memory_space=pltpu.MemorySpace.SMEM),   # alphas (scalars)
            pl.BlockSpec(memory_space=pltpu.MemorySpace.VMEM),   # s0 (C_pp, NLp)
            pl.BlockSpec(memory_space=pltpu.MemorySpace.VMEM),   # s1 (C_p, NLp)
            pl.BlockSpec(memory_space=pltpu.MemorySpace.VMEM),   # preprocess0 weight
            pl.BlockSpec(memory_space=pltpu.MemorySpace.VMEM),   # preprocess1 weight
            pl.BlockSpec(memory_space=pltpu.MemorySpace.VMEM),   # conv_3 weights
        ],
        out_specs=pl.BlockSpec(memory_space=pltpu.MemorySpace.VMEM),
    )(weights_1.astype(jnp.float32), s0_2d, s1_2d,
      params["pre0_w"].astype(jnp.float32), params["pre1_w"].astype(jnp.float32),
      w_conv_flat)

    out = out2d[:, :nl].reshape(multiplier * c, n, length)
    return jnp.transpose(out, (1, 0, 2))   # back to (N, multiplier*C, L)


if __name__ == "__main__":
    key = jax.random.PRNGKey(0)
    N, L = 2, 16
    C_pp, C_p, C = 8, 8, 8
    steps, multiplier = 2, 2
    num_edges = sum(2 + i for i in range(steps))  # 2 + 3 = 5 MixedOp edges

    ks = jax.random.split(key, 6)
    s0 = jax.random.normal(ks[0], (N, C_pp, L), jnp.float32)
    s1 = jax.random.normal(ks[1], (N, C_p, L), jnp.float32)

    params = {
        "pre0_w": 0.1 * jax.random.normal(ks[2], (C, C_pp), jnp.float32),
        "pre1_w": 0.1 * jax.random.normal(ks[3], (C, C_p), jnp.float32),
        # PyTorch Conv1d weight layout (C_out, C_in, K=3) per MixedOp edge.
        "op_w": 0.1 * jax.random.normal(ks[4], (num_edges, C, C, 3), jnp.float32),
    }
    weights_1 = jax.nn.softmax(
        jax.random.normal(ks[5], (num_edges, NUM_PRIM), jnp.float32), axis=-1)
    weights_2 = jnp.zeros((0, NUM_PRIM), jnp.float32)  # ignored when reduction=False

    run = jax.jit(functools.partial(cell_bread_encoder,
                                    steps=steps, multiplier=multiplier))
    out = run(s0, s1, weights_1, weights_2, params)
    jax.block_until_ready(out)
    assert out.shape == (N, multiplier * C, L), out.shape
    assert bool(jnp.all(jnp.isfinite(out)))
    print("KERNEL_OK")
</pallas_src>

<mosaic_0001>
module attributes {stable_mosaic.version = 11 : i64} {
  func.func @_cell_kernel(%arg0: memref<5x5xf32, #tpu.memory_space<smem>>, %arg1: memref<8x128xf32, #tpu.memory_space<vmem>>, %arg2: memref<8x128xf32, #tpu.memory_space<vmem>>, %arg3: memref<8x8xf32, #tpu.memory_space<vmem>>, %arg4: memref<8x8xf32, #tpu.memory_space<vmem>>, %arg5: memref<5x8x24xf32, #tpu.memory_space<vmem>>, %arg6: memref<16x128xf32, #tpu.memory_space<vmem>>) attributes {dimension_semantics = [], scalar_prefetch = 0 : i64, scratch_operands = 0 : i64, tpu.core_type = #tpu.core_type<tc>} {
    %0 = tpu.iota {dimensions = array<i32: 1>} : vector<1x128xi32>
    %c32_i32 = arith.constant 32 : i32
    %1 = vector.broadcast %c32_i32 : i32 to vector<1x128xi32>
    %2 = arith.cmpi slt, %0, %1 : vector<1x128xi32>
    %c16_i32 = arith.constant 16 : i32
    %c0_i32 = arith.constant 0 : i32
    %3 = arith.cmpi eq, %c16_i32, %c0_i32 : i32
    %c1_i32 = arith.constant 1 : i32
    %4 = arith.select %3, %c1_i32, %c16_i32 : i32
    %5 = vector.broadcast %4 : i32 to vector<1x128xi32>
    %6 = arith.remsi %0, %5 : vector<1x128xi32>
    %c0_i32_0 = arith.constant 0 : i32
    %7 = vector.broadcast %c0_i32_0 : i32 to vector<1x128xi32>
    %8 = arith.cmpi ne, %6, %7 : vector<1x128xi32>
    %c0_i32_1 = arith.constant 0 : i32
    %9 = vector.broadcast %c0_i32_1 : i32 to vector<1x128xi32>
    %10 = arith.cmpi slt, %6, %9 : vector<1x128xi32>
    %c0_i32_2 = arith.constant 0 : i32
    %11 = arith.cmpi slt, %4, %c0_i32_2 : i32
    %12 = vector.broadcast %11 : i1 to vector<1x128xi1>
    %13 = vector.broadcast %12 : vector<1x128xi1> to vector<1x128xi1>
    %14 = arith.xori %10, %13 : vector<1x128xi1>
    %15 = arith.andi %14, %8 : vector<1x128xi1>
    %16 = vector.broadcast %4 : i32 to vector<1x128xi32>
    %17 = arith.addi %6, %16 : vector<1x128xi32>
    %18 = arith.select %15, %17, %6 : vector<1x128xi1>, vector<1x128xi32>
    %c0_i32_3 = arith.constant 0 : i32
    %19 = vector.broadcast %c0_i32_3 : i32 to vector<1x128xi32>
    %20 = arith.cmpi ne, %18, %19 : vector<1x128xi32>
    %21 = arith.andi %2, %20 : vector<1x128xi1>
    %c15_i32 = arith.constant 15 : i32
    %22 = vector.broadcast %c15_i32 : i32 to vector<1x128xi32>
    %23 = arith.cmpi ne, %18, %22 : vector<1x128xi32>
    %24 = arith.andi %2, %23 : vector<1x128xi1>
    %c0 = arith.constant 0 : index
    %c0_4 = arith.constant 0 : index
    %25 = vector.load %arg1[%c0, %c0_4] : memref<8x128xf32, #tpu.memory_space<vmem>>, vector<8x128xf32>
    %c0_5 = arith.constant 0 : index
    %c0_6 = arith.constant 0 : index
    %26 = vector.load %arg3[%c0_5, %c0_6] : memref<8x8xf32, #tpu.memory_space<vmem>>, vector<8x8xf32>
    %cst = arith.constant 0.000000e+00 : f32
    %27 = vector.broadcast %cst : f32 to vector<8x128xf32>
    %28 = arith.maximumf %25, %27 : vector<8x128xf32>
    %29 = arith.truncf %26 : vector<8x8xf32> to vector<8x8xbf16>
    %30 = arith.truncf %28 : vector<8x128xf32> to vector<8x128xbf16>
    %cst_7 = arith.constant dense<0.000000e+00> : vector<8x128xf32>
    %31 = tpu.matmul %29, %30, %cst_7 {dimension_numbers = #tpu.dot_dimension_numbers<[1], [0], [0], [1], [0, 0, 1, 1], [], []>} : vector<8x8xbf16>, vector<8x128xbf16>, vector<8x128xf32> -> vector<8x128xf32>
    %cst_8 = arith.constant dense<0.000000e+00> : vector<8xf32>
    %32 = vector.multi_reduction <add>, %31, %cst_8 [1] : vector<8x128xf32> to vector<8xf32>
    %33 = vector.shape_cast %32 : vector<8xf32> to vector<8x1xf32>
    %34 = arith.mulf %31, %31 : vector<8x128xf32>
    %cst_9 = arith.constant dense<0.000000e+00> : vector<8xf32>
    %35 = vector.multi_reduction <add>, %34, %cst_9 [1] : vector<8x128xf32> to vector<8xf32>
    %36 = vector.shape_cast %35 : vector<8xf32> to vector<8x1xf32>
    %cst_10 = arith.constant 3.125000e-02 : f32
    %37 = vector.broadcast %cst_10 : f32 to vector<8x1xf32>
    %38 = arith.mulf %33, %37 : vector<8x1xf32>
    %cst_11 = arith.constant 3.125000e-02 : f32
    %39 = vector.broadcast %cst_11 : f32 to vector<8x1xf32>
    %40 = arith.mulf %36, %39 : vector<8x1xf32>
    %41 = arith.mulf %38, %38 : vector<8x1xf32>
    %42 = arith.subf %40, %41 : vector<8x1xf32>
    %cst_12 = arith.constant 0.000000e+00 : f32
    %43 = vector.broadcast %cst_12 : f32 to vector<8x1xf32>
    %44 = arith.maximumf %42, %43 : vector<8x1xf32>
    %cst_13 = arith.constant 9.99999974E-6 : f32
    %45 = vector.broadcast %cst_13 : f32 to vector<8x1xf32>
    %46 = arith.addf %44, %45 : vector<8x1xf32>
    %47 = math.rsqrt %46 : vector<8x1xf32>
    %48 = vector.broadcast %38 : vector<8x1xf32> to vector<8x128xf32>
    %49 = arith.subf %31, %48 : vector<8x128xf32>
    %50 = vector.broadcast %47 : vector<8x1xf32> to vector<8x128xf32>
    %51 = arith.mulf %49, %50 : vector<8x128xf32>
    %cst_14 = arith.constant 0.000000e+00 : f32
    %52 = vector.shape_cast %2 : vector<1x128xi1> to vector<1x128xi1>
    %53 = vector.broadcast %52 : vector<1x128xi1> to vector<8x128xi1>
    %54 = vector.broadcast %cst_14 : f32 to vector<8x128xf32>
    %55 = arith.select %53, %51, %54 : vector<8x128xi1>, vector<8x128xf32>
    %c0_15 = arith.constant 0 : index
    %c0_16 = arith.constant 0 : index
    %56 = vector.load %arg2[%c0_15, %c0_16] : memref<8x128xf32, #tpu.memory_space<vmem>>, vector<8x128xf32>
    %c0_17 = arith.constant 0 : index
    %c0_18 = arith.constant 0 : index
    %57 = vector.load %arg4[%c0_17, %c0_18] : memref<8x8xf32, #tpu.memory_space<vmem>>, vector<8x8xf32>
    %cst_19 = arith.constant 0.000000e+00 : f32
    %58 = vector.broadcast %cst_19 : f32 to vector<8x128xf32>
    %59 = arith.maximumf %56, %58 : vector<8x128xf32>
    %60 = arith.truncf %57 : vector<8x8xf32> to vector<8x8xbf16>
    %61 = arith.truncf %59 : vector<8x128xf32> to vector<8x128xbf16>
    %cst_20 = arith.constant dense<0.000000e+00> : vector<8x128xf32>
    %62 = tpu.matmul %60, %61, %cst_20 {dimension_numbers = #tpu.dot_dimension_numbers<[1], [0], [0], [1], [0, 0, 1, 1], [], []>} : vector<8x8xbf16>, vector<8x128xbf16>, vector<8x128xf32> -> vector<8x128xf32>
    %cst_21 = arith.constant dense<0.000000e+00> : vector<8xf32>
    %63 = vector.multi_reduction <add>, %62, %cst_21 [1] : vector<8x128xf32> to vector<8xf32>
    %64 = vector.shape_cast %63 : vector<8xf32> to vector<8x1xf32>
    %65 = arith.mulf %62, %62 : vector<8x128xf32>
    %cst_22 = arith.constant dense<0.000000e+00> : vector<8xf32>
    %66 = vector.multi_reduction <add>, %65, %cst_22 [1] : vector<8x128xf32> to vector<8xf32>
    %67 = vector.shape_cast %66 : vector<8xf32> to vector<8x1xf32>
    %cst_23 = arith.constant 3.125000e-02 : f32
    %68 = vector.broadcast %cst_23 : f32 to vector<8x1xf32>
    %69 = arith.mulf %64, %68 : vector<8x1xf32>
    %cst_24 = arith.constant 3.125000e-02 : f32
    %70 = vector.broadcast %cst_24 : f32 to vector<8x1xf32>
    %71 = arith.mulf %67, %70 : vector<8x1xf32>
    %72 = arith.mulf %69, %69 : vector<8x1xf32>
    %73 = arith.subf %71, %72 : vector<8x1xf32>
    %cst_25 = arith.constant 0.000000e+00 : f32
    %74 = vector.broadcast %cst_25 : f32 to vector<8x1xf32>
    %75 = arith.maximumf %73, %74 : vector<8x1xf32>
    %cst_26 = arith.constant 9.99999974E-6 : f32
    %76 = vector.broadcast %cst_26 : f32 to vector<8x1xf32>
    %77 = arith.addf %75, %76 : vector<8x1xf32>
    %78 = math.rsqrt %77 : vector<8x1xf32>
    %79 = vector.broadcast %69 : vector<8x1xf32> to vector<8x128xf32>
    %80 = arith.subf %62, %79 : vector<8x128xf32>
    %81 = vector.broadcast %78 : vector<8x1xf32> to vector<8x128xf32>
    %82 = arith.mulf %80, %81 : vector<8x128xf32>
    %cst_27 = arith.constant 0.000000e+00 : f32
    %83 = vector.shape_cast %2 : vector<1x128xi1> to vector<1x128xi1>
    %84 = vector.broadcast %83 : vector<1x128xi1> to vector<8x128xi1>
    %85 = vector.broadcast %cst_27 : f32 to vector<8x128xf32>
    %86 = arith.select %84, %82, %85 : vector<8x128xi1>, vector<8x128xf32>
    %c0_28 = arith.constant 0 : index
    %c0_29 = arith.constant 0 : index
    %c0_30 = arith.constant 0 : index
    %87 = vector.load %arg5[%c0_28, %c0_29, %c0_30] : memref<5x8x24xf32, #tpu.memory_space<vmem>>, vector<1x8x24xf32>
    %88 = vector.shape_cast %87 : vector<1x8x24xf32> to vector<8x24xf32>
    %c1_i32_31 = arith.constant 1 : i32
    %89 = tpu.dynamic_rotate %55 by %c1_i32_31 dim 1 : vector<8x128xf32>, i32 -> vector<8x128xf32>
    %c127_i32 = arith.constant 127 : i32
    %90 = tpu.dynamic_rotate %55 by %c127_i32 dim 1 : vector<8x128xf32>, i32 -> vector<8x128xf32>
    %cst_32 = arith.constant 0xFF800000 : f32
    %91 = vector.shape_cast %21 : vector<1x128xi1> to vector<1x128xi1>
    %92 = vector.broadcast %91 : vector<1x128xi1> to vector<8x128xi1>
    %93 = vector.broadcast %cst_32 : f32 to vector<8x128xf32>
    %94 = arith.select %92, %89, %93 : vector<8x128xi1>, vector<8x128xf32>
    %95 = arith.maximumf %94, %55 : vector<8x128xf32>
    %cst_33 = arith.constant 0xFF800000 : f32
    %96 = vector.shape_cast %24 : vector<1x128xi1> to vector<1x128xi1>
    %97 = vector.broadcast %96 : vector<1x128xi1> to vector<8x128xi1>
    %98 = vector.broadcast %cst_33 : f32 to vector<8x128xf32>
    %99 = arith.select %97, %90, %98 : vector<8x128xi1>, vector<8x128xf32>
    %100 = arith.maximumf %95, %99 : vector<8x128xf32>
    %cst_34 = arith.constant dense<0.000000e+00> : vector<8xf32>
    %101 = vector.multi_reduction <add>, %100, %cst_34 [1] : vector<8x128xf32> to vector<8xf32>
    %102 = vector.shape_cast %101 : vector<8xf32> to vector<8x1xf32>
    %103 = arith.mulf %100, %100 : vector<8x128xf32>
    %cst_35 = arith.constant dense<0.000000e+00> : vector<8xf32>
    %104 = vector.multi_reduction <add>, %103, %cst_35 [1] : vector<8x128xf32> to vector<8xf32>
    %105 = vector.shape_cast %104 : vector<8xf32> to vector<8x1xf32>
    %cst_36 = arith.constant 3.125000e-02 : f32
    %106 = vector.broadcast %cst_36 : f32 to vector<8x1xf32>
    %107 = arith.mulf %102, %106 : vector<8x1xf32>
    %cst_37 = arith.constant 3.125000e-02 : f32
    %108 = vector.broadcast %cst_37 : f32 to vector<8x1xf32>
    %109 = arith.mulf %105, %108 : vector<8x1xf32>
    %110 = arith.mulf %107, %107 : vector<8x1xf32>
    %111 = arith.subf %109, %110 : vector<8x1xf32>
    %cst_38 = arith.constant 0.000000e+00 : f32
    %112 = vector.broadcast %cst_38 : f32 to vector<8x1xf32>
    %113 = arith.maximumf %111, %112 : vector<8x1xf32>
    %cst_39 = arith.constant 9.99999974E-6 : f32
    %114 = vector.broadcast %cst_39 : f32 to vector<8x1xf32>
    %115 = arith.addf %113, %114 : vector<8x1xf32>
    %116 = math.rsqrt %115 : vector<8x1xf32>
    %117 = vector.broadcast %107 : vector<8x1xf32> to vector<8x128xf32>
    %118 = arith.subf %100, %117 : vector<8x128xf32>
    %119 = vector.broadcast %116 : vector<8x1xf32> to vector<8x128xf32>
    %120 = arith.mulf %118, %119 : vector<8x128xf32>
    %cst_40 = arith.constant 0.000000e+00 : f32
    %121 = vector.shape_cast %2 : vector<1x128xi1> to vector<1x128xi1>
    %122 = vector.broadcast %121 : vector<1x128xi1> to vector<8x128xi1>
    %123 = vector.broadcast %cst_40 : f32 to vector<8x128xf32>
    %124 = arith.select %122, %120, %123 : vector<8x128xi1>, vector<8x128xf32>
    %cst_41 = arith.constant 0.000000e+00 : f32
    %125 = vector.shape_cast %21 : vector<1x128xi1> to vector<1x128xi1>
    %126 = vector.broadcast %125 : vector<1x128xi1> to vector<8x128xi1>
    %127 = vector.broadcast %cst_41 : f32 to vector<8x128xf32>
    %128 = arith.select %126, %89, %127 : vector<8x128xi1>, vector<8x128xf32>
    %129 = arith.addf %128, %55 : vector<8x128xf32>
    %cst_42 = arith.constant 0.000000e+00 : f32
    %130 = vector.shape_cast %24 : vector<1x128xi1> to vector<1x128xi1>
    %131 = vector.broadcast %130 : vector<1x128xi1> to vector<8x128xi1>
    %132 = vector.broadcast %cst_42 : f32 to vector<8x128xf32>
    %133 = arith.select %131, %90, %132 : vector<8x128xi1>, vector<8x128xf32>
    %134 = arith.addf %129, %133 : vector<8x128xf32>
    %cst_43 = arith.constant 0.333333343 : f32
    %135 = vector.broadcast %cst_43 : f32 to vector<8x128xf32>
    %136 = arith.mulf %134, %135 : vector<8x128xf32>
    %cst_44 = arith.constant dense<0.000000e+00> : vector<8xf32>
    %137 = vector.multi_reduction <add>, %136, %cst_44 [1] : vector<8x128xf32> to vector<8xf32>
    %138 = vector.shape_cast %137 : vector<8xf32> to vector<8x1xf32>
    %139 = arith.mulf %136, %136 : vector<8x128xf32>
    %cst_45 = arith.constant dense<0.000000e+00> : vector<8xf32>
    %140 = vector.multi_reduction <add>, %139, %cst_45 [1] : vector<8x128xf32> to vector<8xf32>
    %141 = vector.shape_cast %140 : vector<8xf32> to vector<8x1xf32>
    %cst_46 = arith.constant 3.125000e-02 : f32
    %142 = vector.broadcast %cst_46 : f32 to vector<8x1xf32>
    %143 = arith.mulf %138, %142 : vector<8x1xf32>
    %cst_47 = arith.constant 3.125000e-02 : f32
    %144 = vector.broadcast %cst_47 : f32 to vector<8x1xf32>
    %145 = arith.mulf %141, %144 : vector<8x1xf32>
    %146 = arith.mulf %143, %143 : vector<8x1xf32>
    %147 = arith.subf %145, %146 : vector<8x1xf32>
    %cst_48 = arith.constant 0.000000e+00 : f32
    %148 = vector.broadcast %cst_48 : f32 to vector<8x1xf32>
    %149 = arith.maximumf %147, %148 : vector<8x1xf32>
    %cst_49 = arith.constant 9.99999974E-6 : f32
    %150 = vector.broadcast %cst_49 : f32 to vector<8x1xf32>
    %151 = arith.addf %149, %150 : vector<8x1xf32>
    %152 = math.rsqrt %151 : vector<8x1xf32>
    %153 = vector.broadcast %143 : vector<8x1xf32> to vector<8x128xf32>
    %154 = arith.subf %136, %153 : vector<8x128xf32>
    %155 = vector.broadcast %152 : vector<8x1xf32> to vector<8x128xf32>
    %156 = arith.mulf %154, %155 : vector<8x128xf32>
    %cst_50 = arith.constant 0.000000e+00 : f32
    %157 = vector.shape_cast %2 : vector<1x128xi1> to vector<1x128xi1>
    %158 = vector.broadcast %157 : vector<1x128xi1> to vector<8x128xi1>
    %159 = vector.broadcast %cst_50 : f32 to vector<8x128xf32>
    %160 = arith.select %158, %156, %159 : vector<8x128xi1>, vector<8x128xf32>
    %cst_51 = arith.constant 0.000000e+00 : f32
    %161 = vector.broadcast %cst_51 : f32 to vector<8x128xf32>
    %162 = arith.maximumf %55, %161 : vector<8x128xf32>
    %c1_i32_52 = arith.constant 1 : i32
    %163 = tpu.dynamic_rotate %162 by %c1_i32_52 dim 1 : vector<8x128xf32>, i32 -> vector<8x128xf32>
    %cst_53 = arith.constant 0.000000e+00 : f32
    %164 = vector.shape_cast %21 : vector<1x128xi1> to vector<1x128xi1>
    %165 = vector.broadcast %164 : vector<1x128xi1> to vector<8x128xi1>
    %166 = vector.broadcast %cst_53 : f32 to vector<8x128xf32>
    %167 = arith.select %165, %163, %166 : vector<8x128xi1>, vector<8x128xf32>
    %c127_i32_54 = arith.constant 127 : i32
    %168 = tpu.dynamic_rotate %162 by %c127_i32_54 dim 1 : vector<8x128xf32>, i32 -> vector<8x128xf32>
    %cst_55 = arith.constant 0.000000e+00 : f32
    %169 = vector.shape_cast %24 : vector<1x128xi1> to vector<1x128xi1>
    %170 = vector.broadcast %169 : vector<1x128xi1> to vector<8x128xi1>
    %171 = vector.broadcast %cst_55 : f32 to vector<8x128xf32>
    %172 = arith.select %170, %168, %171 : vector<8x128xi1>, vector<8x128xf32>
    %173 = tpu.concatenate %167, %162, %172 in 0 : vector<8x128xf32>, vector<8x128xf32>, vector<8x128xf32> -> vector<24x128xf32>
    %174 = arith.truncf %88 : vector<8x24xf32> to vector<8x24xbf16>
    %175 = arith.truncf %173 : vector<24x128xf32> to vector<24x128xbf16>
    %cst_56 = arith.constant dense<0.000000e+00> : vector<8x128xf32>
    %176 = tpu.matmul %174, %175, %cst_56 {dimension_numbers = #tpu.dot_dimension_numbers<[1], [0], [0], [1], [0, 0, 1, 1], [], []>} : vector<8x24xbf16>, vector<24x128xbf16>, vector<8x128xf32> -> vector<8x128xf32>
    %cst_57 = arith.constant dense<0.000000e+00> : vector<8xf32>
    %177 = vector.multi_reduction <add>, %176, %cst_57 [1] : vector<8x128xf32> to vector<8xf32>
    %178 = vector.shape_cast %177 : vector<8xf32> to vector<8x1xf32>
    %179 = arith.mulf %176, %176 : vector<8x128xf32>
    %cst_58 = arith.constant dense<0.000000e+00> : vector<8xf32>
    %180 = vector.multi_reduction <add>, %179, %cst_58 [1] : vector<8x128xf32> to vector<8xf32>
    %181 = vector.shape_cast %180 : vector<8xf32> to vector<8x1xf32>
    %cst_59 = arith.constant 3.125000e-02 : f32
    %182 = vector.broadcast %cst_59 : f32 to vector<8x1xf32>
    %183 = arith.mulf %178, %182 : vector<8x1xf32>
    %cst_60 = arith.constant 3.125000e-02 : f32
    %184 = vector.broadcast %cst_60 : f32 to vector<8x1xf32>
    %185 = arith.mulf %181, %184 : vector<8x1xf32>
    %186 = arith.mulf %183, %183 : vector<8x1xf32>
    %187 = arith.subf %185, %186 : vector<8x1xf32>
    %cst_61 = arith.constant 0.000000e+00 : f32
    %188 = vector.broadcast %cst_61 : f32 to vector<8x1xf32>
    %189 = arith.maximumf %187, %188 : vector<8x1xf32>
    %cst_62 = arith.constant 9.99999974E-6 : f32
    %190 = vector.broadcast %cst_62 : f32 to vector<8x1xf32>
    %191 = arith.addf %189, %190 : vector<8x1xf32>
    %192 = math.rsqrt %191 : vector<8x1xf32>
    %193 = vector.broadcast %183 : vector<8x1xf32> to vector<8x128xf32>
    %194 = arith.subf %176, %193 : vector<8x128xf32>
    %195 = vector.broadcast %192 : vector<8x1xf32> to vector<8x128xf32>
    %196 = arith.mulf %194, %195 : vector<8x128xf32>
    %cst_63 = arith.constant 0.000000e+00 : f32
    %197 = vector.shape_cast %2 : vector<1x128xi1> to vector<1x128xi1>
    %198 = vector.broadcast %197 : vector<1x128xi1> to vector<8x128xi1>
    %199 = vector.broadcast %cst_63 : f32 to vector<8x128xf32>
    %200 = arith.select %198, %196, %199 : vector<8x128xi1>, vector<8x128xf32>
    %c0_64 = arith.constant 0 : index
    %c1 = arith.constant 1 : index
    %201 = memref.load %arg0[%c0_64, %c1] : memref<5x5xf32, #tpu.memory_space<smem>>
    %c0_65 = arith.constant 0 : index
    %c2 = arith.constant 2 : index
    %202 = memref.load %arg0[%c0_65, %c2] : memref<5x5xf32, #tpu.memory_space<smem>>
    %c0_66 = arith.constant 0 : index
    %c3 = arith.constant 3 : index
    %203 = memref.load %arg0[%c0_66, %c3] : memref<5x5xf32, #tpu.memory_space<smem>>
    %c0_67 = arith.constant 0 : index
    %c4 = arith.constant 4 : index
    %204 = memref.load %arg0[%c0_67, %c4] : memref<5x5xf32, #tpu.memory_space<smem>>
    %205 = vector.broadcast %201 : f32 to vector<8x128xf32>
    %206 = arith.mulf %205, %55 : vector<8x128xf32>
    %207 = vector.broadcast %202 : f32 to vector<8x128xf32>
    %208 = arith.mulf %207, %124 : vector<8x128xf32>
    %209 = arith.addf %206, %208 : vector<8x128xf32>
    %210 = vector.broadcast %203 : f32 to vector<8x128xf32>
    %211 = arith.mulf %210, %160 : vector<8x128xf32>
    %212 = arith.addf %209, %211 : vector<8x128xf32>
    %213 = vector.broadcast %204 : f32 to vector<8x128xf32>
    %214 = arith.mulf %213, %200 : vector<8x128xf32>
    %215 = arith.addf %212, %214 : vector<8x128xf32>
    %c1_68 = arith.constant 1 : index
    %c0_69 = arith.constant 0 : index
    %c0_70 = arith.constant 0 : index
    %216 = vector.load %arg5[%c1_68, %c0_69, %c0_70] : memref<5x8x24xf32, #tpu.memory_space<vmem>>, vector<1x8x24xf32>
    %217 = vector.shape_cast %216 : vector<1x8x24xf32> to vector<8x24xf32>
    %c1_i32_71 = arith.constant 1 : i32
    %218 = tpu.dynamic_rotate %86 by %c1_i32_71 dim 1 : vector<8x128xf32>, i32 -> vector<8x128xf32>
    %c127_i32_72 = arith.constant 127 : i32
    %219 = tpu.dynamic_rotate %86 by %c127_i32_72 dim 1 : vector<8x128xf32>, i32 -> vector<8x128xf32>
    %cst_73 = arith.constant 0xFF800000 : f32
    %220 = vector.shape_cast %21 : vector<1x128xi1> to vector<1x128xi1>
    %221 = vector.broadcast %220 : vector<1x128xi1> to vector<8x128xi1>
    %222 = vector.broadcast %cst_73 : f32 to vector<8x128xf32>
    %223 = arith.select %221, %218, %222 : vector<8x128xi1>, vector<8x128xf32>
    %224 = arith.maximumf %223, %86 : vector<8x128xf32>
    %cst_74 = arith.constant 0xFF800000 : f32
    %225 = vector.shape_cast %24 : vector<1x128xi1> to vector<1x128xi1>
    %226 = vector.broadcast %225 : vector<1x128xi1> to vector<8x128xi1>
    %227 = vector.broadcast %cst_74 : f32 to vector<8x128xf32>
    %228 = arith.select %226, %219, %227 : vector<8x128xi1>, vector<8x128xf32>
    %229 = arith.maximumf %224, %228 : vector<8x128xf32>
    %cst_75 = arith.constant dense<0.000000e+00> : vector<8xf32>
    %230 = vector.multi_reduction <add>, %229, %cst_75 [1] : vector<8x128xf32> to vector<8xf32>
    %231 = vector.shape_cast %230 : vector<8xf32> to vector<8x1xf32>
    %232 = arith.mulf %229, %229 : vector<8x128xf32>
    %cst_76 = arith.constant dense<0.000000e+00> : vector<8xf32>
    %233 = vector.multi_reduction <add>, %232, %cst_76 [1] : vector<8x128xf32> to vector<8xf32>
    %234 = vector.shape_cast %233 : vector<8xf32> to vector<8x1xf32>
    %cst_77 = arith.constant 3.125000e-02 : f32
    %235 = vector.broadcast %cst_77 : f32 to vector<8x1xf32>
    %236 = arith.mulf %231, %235 : vector<8x1xf32>
    %cst_78 = arith.constant 3.125000e-02 : f32
    %237 = vector.broadcast %cst_78 : f32 to vector<8x1xf32>
    %238 = arith.mulf %234, %237 : vector<8x1xf32>
    %239 = arith.mulf %236, %236 : vector<8x1xf32>
    %240 = arith.subf %238, %239 : vector<8x1xf32>
    %cst_79 = arith.constant 0.000000e+00 : f32
    %241 = vector.broadcast %cst_79 : f32 to vector<8x1xf32>
    %242 = arith.maximumf %240, %241 : vector<8x1xf32>
    %cst_80 = arith.constant 9.99999974E-6 : f32
    %243 = vector.broadcast %cst_80 : f32 to vector<8x1xf32>
    %244 = arith.addf %242, %243 : vector<8x1xf32>
    %245 = math.rsqrt %244 : vector<8x1xf32>
    %246 = vector.broadcast %236 : vector<8x1xf32> to vector<8x128xf32>
    %247 = arith.subf %229, %246 : vector<8x128xf32>
    %248 = vector.broadcast %245 : vector<8x1xf32> to vector<8x128xf32>
    %249 = arith.mulf %247, %248 : vector<8x128xf32>
    %cst_81 = arith.constant 0.000000e+00 : f32
    %250 = vector.shape_cast %2 : vector<1x128xi1> to vector<1x128xi1>
    %251 = vector.broadcast %250 : vector<1x128xi1> to vector<8x128xi1>
    %252 = vector.broadcast %cst_81 : f32 to vector<8x128xf32>
    %253 = arith.select %251, %249, %252 : vector<8x128xi1>, vector<8x128xf32>
    %cst_82 = arith.constant 0.000000e+00 : f32
    %254 = vector.shape_cast %21 : vector<1x128xi1> to vector<1x128xi1>
    %255 = vector.broadcast %254 : vector<1x128xi1> to vector<8x128xi1>
    %256 = vector.broadcast %cst_82 : f32 to vector<8x128xf32>
    %257 = arith.select %255, %218, %256 : vector<8x128xi1>, vector<8x128xf32>
    %258 = arith.addf %257, %86 : vector<8x128xf32>
    %cst_83 = arith.constant 0.000000e+00 : f32
    %259 = vector.shape_cast %24 : vector<1x128xi1> to vector<1x128xi1>
    %260 = vector.broadcast %259 : vector<1x128xi1> to vector<8x128xi1>
    %261 = vector.broadcast %cst_83 : f32 to vector<8x128xf32>
    %262 = arith.select %260, %219, %261 : vector<8x128xi1>, vector<8x128xf32>
    %263 = arith.addf %258, %262 : vector<8x128xf32>
    %cst_84 = arith.constant 0.333333343 : f32
    %264 = vector.broadcast %cst_84 : f32 to vector<8x128xf32>
    %265 = arith.mulf %263, %264 : vector<8x128xf32>
    %cst_85 = arith.constant dense<0.000000e+00> : vector<8xf32>
    %266 = vector.multi_reduction <add>, %265, %cst_85 [1] : vector<8x128xf32> to vector<8xf32>
    %267 = vector.shape_cast %266 : vector<8xf32> to vector<8x1xf32>
    %268 = arith.mulf %265, %265 : vector<8x128xf32>
    %cst_86 = arith.constant dense<0.000000e+00> : vector<8xf32>
    %269 = vector.multi_reduction <add>, %268, %cst_86 [1] : vector<8x128xf32> to vector<8xf32>
    %270 = vector.shape_cast %269 : vector<8xf32> to vector<8x1xf32>
    %cst_87 = arith.constant 3.125000e-02 : f32
    %271 = vector.broadcast %cst_87 : f32 to vector<8x1xf32>
    %272 = arith.mulf %267, %271 : vector<8x1xf32>
    %cst_88 = arith.constant 3.125000e-02 : f32
    %273 = vector.broadcast %cst_88 : f32 to vector<8x1xf32>
    %274 = arith.mulf %270, %273 : vector<8x1xf32>
    %275 = arith.mulf %272, %272 : vector<8x1xf32>
    %276 = arith.subf %274, %275 : vector<8x1xf32>
    %cst_89 = arith.constant 0.000000e+00 : f32
    %277 = vector.broadcast %cst_89 : f32 to vector<8x1xf32>
    %278 = arith.maximumf %276, %277 : vector<8x1xf32>
    %cst_90 = arith.constant 9.99999974E-6 : f32
    %279 = vector.broadcast %cst_90 : f32 to vector<8x1xf32>
    %280 = arith.addf %278, %279 : vector<8x1xf32>
    %281 = math.rsqrt %280 : vector<8x1xf32>
    %282 = vector.broadcast %272 : vector<8x1xf32> to vector<8x128xf32>
    %283 = arith.subf %265, %282 : vector<8x128xf32>
    %284 = vector.broadcast %281 : vector<8x1xf32> to vector<8x128xf32>
    %285 = arith.mulf %283, %284 : vector<8x128xf32>
    %cst_91 = arith.constant 0.000000e+00 : f32
    %286 = vector.shape_cast %2 : vector<1x128xi1> to vector<1x128xi1>
    %287 = vector.broadcast %286 : vector<1x128xi1> to vector<8x128xi1>
    %288 = vector.broadcast %cst_91 : f32 to vector<8x128xf32>
    %289 = arith.select %287, %285, %288 : vector<8x128xi1>, vector<8x128xf32>
    %cst_92 = arith.constant 0.000000e+00 : f32
    %290 = vector.broadcast %cst_92 : f32 to vector<8x128xf32>
    %291 = arith.maximumf %86, %290 : vector<8x128xf32>
    %c1_i32_93 = arith.constant 1 : i32
    %292 = tpu.dynamic_rotate %291 by %c1_i32_93 dim 1 : vector<8x128xf32>, i32 -> vector<8x128xf32>
    %cst_94 = arith.constant 0.000000e+00 : f32
    %293 = vector.shape_cast %21 : vector<1x128xi1> to vector<1x128xi1>
    %294 = vector.broadcast %293 : vector<1x128xi1> to vector<8x128xi1>
    %295 = vector.broadcast %cst_94 : f32 to vector<8x128xf32>
    %296 = arith.select %294, %292, %295 : vector<8x128xi1>, vector<8x128xf32>
    %c127_i32_95 = arith.constant 127 : i32
    %297 = tpu.dynamic_rotate %291 by %c127_i32_95 dim 1 : vector<8x128xf32>, i32 -> vector<8x128xf32>
    %cst_96 = arith.constant 0.000000e+00 : f32
    %298 = vector.shape_cast %24 : vector<1x128xi1> to vector<1x128xi1>
    %299 = vector.broadcast %298 : vector<1x128xi1> to vector<8x128xi1>
    %300 = vector.broadcast %cst_96 : f32 to vector<8x128xf32>
    %301 = arith.select %299, %297, %300 : vector<8x128xi1>, vector<8x128xf32>
    %302 = tpu.concatenate %296, %291, %301 in 0 : vector<8x128xf32>, vector<8x128xf32>, vector<8x128xf32> -> vector<24x128xf32>
    %303 = arith.truncf %217 : vector<8x24xf32> to vector<8x24xbf16>
    %304 = arith.truncf %302 : vector<24x128xf32> to vector<24x128xbf16>
    %cst_97 = arith.constant dense<0.000000e+00> : vector<8x128xf32>
    %305 = tpu.matmul %303, %304, %cst_97 {dimension_numbers = #tpu.dot_dimension_numbers<[1], [0], [0], [1], [0, 0, 1, 1], [], []>} : vector<8x24xbf16>, vector<24x128xbf16>, vector<8x128xf32> -> vector<8x128xf32>
    %cst_98 = arith.constant dense<0.000000e+00> : vector<8xf32>
    %306 = vector.multi_reduction <add>, %305, %cst_98 [1] : vector<8x128xf32> to vector<8xf32>
    %307 = vector.shape_cast %306 : vector<8xf32> to vector<8x1xf32>
    %308 = arith.mulf %305, %305 : vector<8x128xf32>
    %cst_99 = arith.constant dense<0.000000e+00> : vector<8xf32>
    %309 = vector.multi_reduction <add>, %308, %cst_99 [1] : vector<8x128xf32> to vector<8xf32>
    %310 = vector.shape_cast %309 : vector<8xf32> to vector<8x1xf32>
    %cst_100 = arith.constant 3.125000e-02 : f32
    %311 = vector.broadcast %cst_100 : f32 to vector<8x1xf32>
    %312 = arith.mulf %307, %311 : vector<8x1xf32>
    %cst_101 = arith.constant 3.125000e-02 : f32
    %313 = vector.broadcast %cst_101 : f32 to vector<8x1xf32>
    %314 = arith.mulf %310, %313 : vector<8x1xf32>
    %315 = arith.mulf %312, %312 : vector<8x1xf32>
    %316 = arith.subf %314, %315 : vector<8x1xf32>
    %cst_102 = arith.constant 0.000000e+00 : f32
    %317 = vector.broadcast %cst_102 : f32 to vector<8x1xf32>
    %318 = arith.maximumf %316, %317 : vector<8x1xf32>
    %cst_103 = arith.constant 9.99999974E-6 : f32
    %319 = vector.broadcast %cst_103 : f32 to vector<8x1xf32>
    %320 = arith.addf %318, %319 : vector<8x1xf32>
    %321 = math.rsqrt %320 : vector<8x1xf32>
    %322 = vector.broadcast %312 : vector<8x1xf32> to vector<8x128xf32>
    %323 = arith.subf %305, %322 : vector<8x128xf32>
    %324 = vector.broadcast %321 : vector<8x1xf32> to vector<8x128xf32>
    %325 = arith.mulf %323, %324 : vector<8x128xf32>
    %cst_104 = arith.constant 0.000000e+00 : f32
    %326 = vector.shape_cast %2 : vector<1x128xi1> to vector<1x128xi1>
    %327 = vector.broadcast %326 : vector<1x128xi1> to vector<8x128xi1>
    %328 = vector.broadcast %cst_104 : f32 to vector<8x128xf32>
    %329 = arith.select %327, %325, %328 : vector<8x128xi1>, vector<8x128xf32>
    %c1_105 = arith.constant 1 : index
    %c1_106 = arith.constant 1 : index
    %330 = memref.load %arg0[%c1_105, %c1_106] : memref<5x5xf32, #tpu.memory_space<smem>>
    %c1_107 = arith.constant 1 : index
    %c2_108 = arith.constant 2 : index
    %331 = memref.load %arg0[%c1_107, %c2_108] : memref<5x5xf32, #tpu.memory_space<smem>>
    %c1_109 = arith.constant 1 : index
    %c3_110 = arith.constant 3 : index
    %332 = memref.load %arg0[%c1_109, %c3_110] : memref<5x5xf32, #tpu.memory_space<smem>>
    %c1_111 = arith.constant 1 : index
    %c4_112 = arith.constant 4 : index
    %333 = memref.load %arg0[%c1_111, %c4_112] : memref<5x5xf32, #tpu.memory_space<smem>>
    %334 = vector.broadcast %330 : f32 to vector<8x128xf32>
    %335 = arith.mulf %334, %86 : vector<8x128xf32>
    %336 = vector.broadcast %331 : f32 to vector<8x128xf32>
    %337 = arith.mulf %336, %253 : vector<8x128xf32>
    %338 = arith.addf %335, %337 : vector<8x128xf32>
    %339 = vector.broadcast %332 : f32 to vector<8x128xf32>
    %340 = arith.mulf %339, %289 : vector<8x128xf32>
    %341 = arith.addf %338, %340 : vector<8x128xf32>
    %342 = vector.broadcast %333 : f32 to vector<8x128xf32>
    %343 = arith.mulf %342, %329 : vector<8x128xf32>
    %344 = arith.addf %341, %343 : vector<8x128xf32>
    %345 = arith.addf %215, %344 : vector<8x128xf32>
    %c2_113 = arith.constant 2 : index
    %c0_114 = arith.constant 0 : index
    %c0_115 = arith.constant 0 : index
    %346 = vector.load %arg5[%c2_113, %c0_114, %c0_115] : memref<5x8x24xf32, #tpu.memory_space<vmem>>, vector<1x8x24xf32>
    %347 = vector.shape_cast %346 : vector<1x8x24xf32> to vector<8x24xf32>
    %c1_i32_116 = arith.constant 1 : i32
    %348 = tpu.dynamic_rotate %55 by %c1_i32_116 dim 1 : vector<8x128xf32>, i32 -> vector<8x128xf32>
    %c127_i32_117 = arith.constant 127 : i32
    %349 = tpu.dynamic_rotate %55 by %c127_i32_117 dim 1 : vector<8x128xf32>, i32 -> vector<8x128xf32>
    %cst_118 = arith.constant 0xFF800000 : f32
    %350 = vector.shape_cast %21 : vector<1x128xi1> to vector<1x128xi1>
    %351 = vector.broadcast %350 : vector<1x128xi1> to vector<8x128xi1>
    %352 = vector.broadcast %cst_118 : f32 to vector<8x128xf32>
    %353 = arith.select %351, %348, %352 : vector<8x128xi1>, vector<8x128xf32>
    %354 = arith.maximumf %353, %55 : vector<8x128xf32>
    %cst_119 = arith.constant 0xFF800000 : f32
    %355 = vector.shape_cast %24 : vector<1x128xi1> to vector<1x128xi1>
    %356 = vector.broadcast %355 : vector<1x128xi1> to vector<8x128xi1>
    %357 = vector.broadcast %cst_119 : f32 to vector<8x128xf32>
    %358 = arith.select %356, %349, %357 : vector<8x128xi1>, vector<8x128xf32>
    %359 = arith.maximumf %354, %358 : vector<8x128xf32>
    %cst_120 = arith.constant dense<0.000000e+00> : vector<8xf32>
    %360 = vector.multi_reduction <add>, %359, %cst_120 [1] : vector<8x128xf32> to vector<8xf32>
    %361 = vector.shape_cast %360 : vector<8xf32> to vector<8x1xf32>
    %362 = arith.mulf %359, %359 : vector<8x128xf32>
    %cst_121 = arith.constant dense<0.000000e+00> : vector<8xf32>
    %363 = vector.multi_reduction <add>, %362, %cst_121 [1] : vector<8x128xf32> to vector<8xf32>
    %364 = vector.shape_cast %363 : vector<8xf32> to vector<8x1xf32>
    %cst_122 = arith.constant 3.125000e-02 : f32
    %365 = vector.broadcast %cst_122 : f32 to vector<8x1xf32>
    %366 = arith.mulf %361, %365 : vector<8x1xf32>
    %cst_123 = arith.constant 3.125000e-02 : f32
    %367 = vector.broadcast %cst_123 : f32 to vector<8x1xf32>
    %368 = arith.mulf %364, %367 : vector<8x1xf32>
    %369 = arith.mulf %366, %366 : vector<8x1xf32>
    %370 = arith.subf %368, %369 : vector<8x1xf32>
    %cst_124 = arith.constant 0.000000e+00 : f32
    %371 = vector.broadcast %cst_124 : f32 to vector<8x1xf32>
    %372 = arith.maximumf %370, %371 : vector<8x1xf32>
    %cst_125 = arith.constant 9.99999974E-6 : f32
    %373 = vector.broadcast %cst_125 : f32 to vector<8x1xf32>
    %374 = arith.addf %372, %373 : vector<8x1xf32>
    %375 = math.rsqrt %374 : vector<8x1xf32>
    %376 = vector.broadcast %366 : vector<8x1xf32> to vector<8x128xf32>
    %377 = arith.subf %359, %376 : vector<8x128xf32>
    %378 = vector.broadcast %375 : vector<8x1xf32> to vector<8x128xf32>
    %379 = arith.mulf %377, %378 : vector<8x128xf32>
    %cst_126 = arith.constant 0.000000e+00 : f32
    %380 = vector.shape_cast %2 : vector<1x128xi1> to vector<1x128xi1>
    %381 = vector.broadcast %380 : vector<1x128xi1> to vector<8x128xi1>
    %382 = vector.broadcast %cst_126 : f32 to vector<8x128xf32>
    %383 = arith.select %381, %379, %382 : vector<8x128xi1>, vector<8x128xf32>
    %cst_127 = arith.constant 0.000000e+00 : f32
    %384 = vector.shape_cast %21 : vector<1x128xi1> to vector<1x128xi1>
    %385 = vector.broadcast %384 : vector<1x128xi1> to vector<8x128xi1>
    %386 = vector.broadcast %cst_127 : f32 to vector<8x128xf32>
    %387 = arith.select %385, %348, %386 : vector<8x128xi1>, vector<8x128xf32>
    %388 = arith.addf %387, %55 : vector<8x128xf32>
    %cst_128 = arith.constant 0.000000e+00 : f32
    %389 = vector.shape_cast %24 : vector<1x128xi1> to vector<1x128xi1>
    %390 = vector.broadcast %389 : vector<1x128xi1> to vector<8x128xi1>
    %391 = vector.broadcast %cst_128 : f32 to vector<8x128xf32>
    %392 = arith.select %390, %349, %391 : vector<8x128xi1>, vector<8x128xf32>
    %393 = arith.addf %388, %392 : vector<8x128xf32>
    %cst_129 = arith.constant 0.333333343 : f32
    %394 = vector.broadcast %cst_129 : f32 to vector<8x128xf32>
    %395 = arith.mulf %393, %394 : vector<8x128xf32>
    %cst_130 = arith.constant dense<0.000000e+00> : vector<8xf32>
    %396 = vector.multi_reduction <add>, %395, %cst_130 [1] : vector<8x128xf32> to vector<8xf32>
    %397 = vector.shape_cast %396 : vector<8xf32> to vector<8x1xf32>
    %398 = arith.mulf %395, %395 : vector<8x128xf32>
    %cst_131 = arith.constant dense<0.000000e+00> : vector<8xf32>
    %399 = vector.multi_reduction <add>, %398, %cst_131 [1] : vector<8x128xf32> to vector<8xf32>
    %400 = vector.shape_cast %399 : vector<8xf32> to vector<8x1xf32>
    %cst_132 = arith.constant 3.125000e-02 : f32
    %401 = vector.broadcast %cst_132 : f32 to vector<8x1xf32>
    %402 = arith.mulf %397, %401 : vector<8x1xf32>
    %cst_133 = arith.constant 3.125000e-02 : f32
    %403 = vector.broadcast %cst_133 : f32 to vector<8x1xf32>
    %404 = arith.mulf %400, %403 : vector<8x1xf32>
    %405 = arith.mulf %402, %402 : vector<8x1xf32>
    %406 = arith.subf %404, %405 : vector<8x1xf32>
    %cst_134 = arith.constant 0.000000e+00 : f32
    %407 = vector.broadcast %cst_134 : f32 to vector<8x1xf32>
    %408 = arith.maximumf %406, %407 : vector<8x1xf32>
    %cst_135 = arith.constant 9.99999974E-6 : f32
    %409 = vector.broadcast %cst_135 : f32 to vector<8x1xf32>
    %410 = arith.addf %408, %409 : vector<8x1xf32>
    %411 = math.rsqrt %410 : vector<8x1xf32>
    %412 = vector.broadcast %402 : vector<8x1xf32> to vector<8x128xf32>
    %413 = arith.subf %395, %412 : vector<8x128xf32>
    %414 = vector.broadcast %411 : vector<8x1xf32> to vector<8x128xf32>
    %415 = arith.mulf %413, %414 : vector<8x128xf32>
    %cst_136 = arith.constant 0.000000e+00 : f32
    %416 = vector.shape_cast %2 : vector<1x128xi1> to vector<1x128xi1>
    %417 = vector.broadcast %416 : vector<1x128xi1> to vector<8x128xi1>
    %418 = vector.broadcast %cst_136 : f32 to vector<8x128xf32>
    %419 = arith.select %417, %415, %418 : vector<8x128xi1>, vector<8x128xf32>
    %cst_137 = arith.constant 0.000000e+00 : f32
    %420 = vector.broadcast %cst_137 : f32 to vector<8x128xf32>
    %421 = arith.maximumf %55, %420 : vector<8x128xf32>
    %c1_i32_138 = arith.constant 1 : i32
    %422 = tpu.dynamic_rotate %421 by %c1_i32_138 dim 1 : vector<8x128xf32>, i32 -> vector<8x128xf32>
    %cst_139 = arith.constant 0.000000e+00 : f32
    %423 = vector.shape_cast %21 : vector<1x128xi1> to vector<1x128xi1>
    %424 = vector.broadcast %423 : vector<1x128xi1> to vector<8x128xi1>
    %425 = vector.broadcast %cst_139 : f32 to vector<8x128xf32>
    %426 = arith.select %424, %422, %425 : vector<8x128xi1>, vector<8x128xf32>
    %c127_i32_140 = arith.constant 127 : i32
    %427 = tpu.dynamic_rotate %421 by %c127_i32_140 dim 1 : vector<8x128xf32>, i32 -> vector<8x128xf32>
    %cst_141 = arith.constant 0.000000e+00 : f32
    %428 = vector.shape_cast %24 : vector<1x128xi1> to vector<1x128xi1>
    %429 = vector.broadcast %428 : vector<1x128xi1> to vector<8x128xi1>
    %430 = vector.broadcast %cst_141 : f32 to vector<8x128xf32>
    %431 = arith.select %429, %427, %430 : vector<8x128xi1>, vector<8x128xf32>
    %432 = tpu.concatenate %426, %421, %431 in 0 : vector<8x128xf32>, vector<8x128xf32>, vector<8x128xf32> -> vector<24x128xf32>
    %433 = arith.truncf %347 : vector<8x24xf32> to vector<8x24xbf16>
    %434 = arith.truncf %432 : vector<24x128xf32> to vector<24x128xbf16>
    %cst_142 = arith.constant dense<0.000000e+00> : vector<8x128xf32>
    %435 = tpu.matmul %433, %434, %cst_142 {dimension_numbers = #tpu.dot_dimension_numbers<[1], [0], [0], [1], [0, 0, 1, 1], [], []>} : vector<8x24xbf16>, vector<24x128xbf16>, vector<8x128xf32> -> vector<8x128xf32>
    %cst_143 = arith.constant dense<0.000000e+00> : vector<8xf32>
    %436 = vector.multi_reduction <add>, %435, %cst_143 [1] : vector<8x128xf32> to vector<8xf32>
    %437 = vector.shape_cast %436 : vector<8xf32> to vector<8x1xf32>
    %438 = arith.mulf %435, %435 : vector<8x128xf32>
    %cst_144 = arith.constant dense<0.000000e+00> : vector<8xf32>
    %439 = vector.multi_reduction <add>, %438, %cst_144 [1] : vector<8x128xf32> to vector<8xf32>
    %440 = vector.shape_cast %439 : vector<8xf32> to vector<8x1xf32>
    %cst_145 = arith.constant 3.125000e-02 : f32
    %441 = vector.broadcast %cst_145 : f32 to vector<8x1xf32>
    %442 = arith.mulf %437, %441 : vector<8x1xf32>
    %cst_146 = arith.constant 3.125000e-02 : f32
    %443 = vector.broadcast %cst_146 : f32 to vector<8x1xf32>
    %444 = arith.mulf %440, %443 : vector<8x1xf32>
    %445 = arith.mulf %442, %442 : vector<8x1xf32>
    %446 = arith.subf %444, %445 : vector<8x1xf32>
    %cst_147 = arith.constant 0.000000e+00 : f32
    %447 = vector.broadcast %cst_147 : f32 to vector<8x1xf32>
    %448 = arith.maximumf %446, %447 : vector<8x1xf32>
    %cst_148 = arith.constant 9.99999974E-6 : f32
    %449 = vector.broadcast %cst_148 : f32 to vector<8x1xf32>
    %450 = arith.addf %448, %449 : vector<8x1xf32>
    %451 = math.rsqrt %450 : vector<8x1xf32>
    %452 = vector.broadcast %442 : vector<8x1xf32> to vector<8x128xf32>
    %453 = arith.subf %435, %452 : vector<8x128xf32>
    %454 = vector.broadcast %451 : vector<8x1xf32> to vector<8x128xf32>
    %455 = arith.mulf %453, %454 : vector<8x128xf32>
    %cst_149 = arith.constant 0.000000e+00 : f32
    %456 = vector.shape_cast %2 : vector<1x128xi1> to vector<1x128xi1>
    %457 = vector.broadcast %456 : vector<1x128xi1> to vector<8x128xi1>
    %458 = vector.broadcast %cst_149 : f32 to vector<8x128xf32>
    %459 = arith.select %457, %455, %458 : vector<8x128xi1>, vector<8x128xf32>
    %c2_150 = arith.constant 2 : index
    %c1_151 = arith.constant 1 : index
    %460 = memref.load %arg0[%c2_150, %c1_151] : memref<5x5xf32, #tpu.memory_space<smem>>
    %c2_152 = arith.constant 2 : index
    %c2_153 = arith.constant 2 : index
    %461 = memref.load %arg0[%c2_152, %c2_153] : memref<5x5xf32, #tpu.memory_space<smem>>
    %c2_154 = arith.constant 2 : index
    %c3_155 = arith.constant 3 : index
    %462 = memref.load %arg0[%c2_154, %c3_155] : memref<5x5xf32, #tpu.memory_space<smem>>
    %c2_156 = arith.constant 2 : index
    %c4_157 = arith.constant 4 : index
    %463 = memref.load %arg0[%c2_156, %c4_157] : memref<5x5xf32, #tpu.memory_space<smem>>
    %464 = vector.broadcast %460 : f32 to vector<8x128xf32>
    %465 = arith.mulf %464, %55 : vector<8x128xf32>
    %466 = vector.broadcast %461 : f32 to vector<8x128xf32>
    %467 = arith.mulf %466, %383 : vector<8x128xf32>
    %468 = arith.addf %465, %467 : vector<8x128xf32>
    %469 = vector.broadcast %462 : f32 to vector<8x128xf32>
    %470 = arith.mulf %469, %419 : vector<8x128xf32>
    %471 = arith.addf %468, %470 : vector<8x128xf32>
    %472 = vector.broadcast %463 : f32 to vector<8x128xf32>
    %473 = arith.mulf %472, %459 : vector<8x128xf32>
    %474 = arith.addf %471, %473 : vector<8x128xf32>
    %c3_158 = arith.constant 3 : index
    %c0_159 = arith.constant 0 : index
    %c0_160 = arith.constant 0 : index
    %475 = vector.load %arg5[%c3_158, %c0_159, %c0_160] : memref<5x8x24xf32, #tpu.memory_space<vmem>>, vector<1x8x24xf32>
    %476 = vector.shape_cast %475 : vector<1x8x24xf32> to vector<8x24xf32>
    %c1_i32_161 = arith.constant 1 : i32
    %477 = tpu.dynamic_rotate %86 by %c1_i32_161 dim 1 : vector<8x128xf32>, i32 -> vector<8x128xf32>
    %c127_i32_162 = arith.constant 127 : i32
    %478 = tpu.dynamic_rotate %86 by %c127_i32_162 dim 1 : vector<8x128xf32>, i32 -> vector<8x128xf32>
    %cst_163 = arith.constant 0xFF800000 : f32
    %479 = vector.shape_cast %21 : vector<1x128xi1> to vector<1x128xi1>
    %480 = vector.broadcast %479 : vector<1x128xi1> to vector<8x128xi1>
    %481 = vector.broadcast %cst_163 : f32 to vector<8x128xf32>
    %482 = arith.select %480, %477, %481 : vector<8x128xi1>, vector<8x128xf32>
    %483 = arith.maximumf %482, %86 : vector<8x128xf32>
    %cst_164 = arith.constant 0xFF800000 : f32
    %484 = vector.shape_cast %24 : vector<1x128xi1> to vector<1x128xi1>
    %485 = vector.broadcast %484 : vector<1x128xi1> to vector<8x128xi1>
    %486 = vector.broadcast %cst_164 : f32 to vector<8x128xf32>
    %487 = arith.select %485, %478, %486 : vector<8x128xi1>, vector<8x128xf32>
    %488 = arith.maximumf %483, %487 : vector<8x128xf32>
    %cst_165 = arith.constant dense<0.000000e+00> : vector<8xf32>
    %489 = vector.multi_reduction <add>, %488, %cst_165 [1] : vector<8x128xf32> to vector<8xf32>
    %490 = vector.shape_cast %489 : vector<8xf32> to vector<8x1xf32>
    %491 = arith.mulf %488, %488 : vector<8x128xf32>
    %cst_166 = arith.constant dense<0.000000e+00> : vector<8xf32>
    %492 = vector.multi_reduction <add>, %491, %cst_166 [1] : vector<8x128xf32> to vector<8xf32>
    %493 = vector.shape_cast %492 : vector<8xf32> to vector<8x1xf32>
    %cst_167 = arith.constant 3.125000e-02 : f32
    %494 = vector.broadcast %cst_167 : f32 to vector<8x1xf32>
    %495 = arith.mulf %490, %494 : vector<8x1xf32>
    %cst_168 = arith.constant 3.125000e-02 : f32
    %496 = vector.broadcast %cst_168 : f32 to vector<8x1xf32>
    %497 = arith.mulf %493, %496 : vector<8x1xf32>
    %498 = arith.mulf %495, %495 : vector<8x1xf32>
    %499 = arith.subf %497, %498 : vector<8x1xf32>
    %cst_169 = arith.constant 0.000000e+00 : f32
    %500 = vector.broadcast %cst_169 : f32 to vector<8x1xf32>
    %501 = arith.maximumf %499, %500 : vector<8x1xf32>
    %cst_170 = arith.constant 9.99999974E-6 : f32
    %502 = vector.broadcast %cst_170 : f32 to vector<8x1xf32>
    %503 = arith.addf %501, %502 : vector<8x1xf32>
    %504 = math.rsqrt %503 : vector<8x1xf32>
    %505 = vector.broadcast %495 : vector<8x1xf32> to vector<8x128xf32>
    %506 = arith.subf %488, %505 : vector<8x128xf32>
    %507 = vector.broadcast %504 : vector<8x1xf32> to vector<8x128xf32>
    %508 = arith.mulf %506, %507 : vector<8x128xf32>
    %cst_171 = arith.constant 0.000000e+00 : f32
    %509 = vector.shape_cast %2 : vector<1x128xi1> to vector<1x128xi1>
    %510 = vector.broadcast %509 : vector<1x128xi1> to vector<8x128xi1>
    %511 = vector.broadcast %cst_171 : f32 to vector<8x128xf32>
    %512 = arith.select %510, %508, %511 : vector<8x128xi1>, vector<8x128xf32>
    %cst_172 = arith.constant 0.000000e+00 : f32
    %513 = vector.shape_cast %21 : vector<1x128xi1> to vector<1x128xi1>
    %514 = vector.broadcast %513 : vector<1x128xi1> to vector<8x128xi1>
    %515 = vector.broadcast %cst_172 : f32 to vector<8x128xf32>
    %516 = arith.select %514, %477, %515 : vector<8x128xi1>, vector<8x128xf32>
    %517 = arith.addf %516, %86 : vector<8x128xf32>
    %cst_173 = arith.constant 0.000000e+00 : f32
    %518 = vector.shape_cast %24 : vector<1x128xi1> to vector<1x128xi1>
    %519 = vector.broadcast %518 : vector<1x128xi1> to vector<8x128xi1>
    %520 = vector.broadcast %cst_173 : f32 to vector<8x128xf32>
    %521 = arith.select %519, %478, %520 : vector<8x128xi1>, vector<8x128xf32>
    %522 = arith.addf %517, %521 : vector<8x128xf32>
    %cst_174 = arith.constant 0.333333343 : f32
    %523 = vector.broadcast %cst_174 : f32 to vector<8x128xf32>
    %524 = arith.mulf %522, %523 : vector<8x128xf32>
    %cst_175 = arith.constant dense<0.000000e+00> : vector<8xf32>
    %525 = vector.multi_reduction <add>, %524, %cst_175 [1] : vector<8x128xf32> to vector<8xf32>
    %526 = vector.shape_cast %525 : vector<8xf32> to vector<8x1xf32>
    %527 = arith.mulf %524, %524 : vector<8x128xf32>
    %cst_176 = arith.constant dense<0.000000e+00> : vector<8xf32>
    %528 = vector.multi_reduction <add>, %527, %cst_176 [1] : vector<8x128xf32> to vector<8xf32>
    %529 = vector.shape_cast %528 : vector<8xf32> to vector<8x1xf32>
    %cst_177 = arith.constant 3.125000e-02 : f32
    %530 = vector.broadcast %cst_177 : f32 to vector<8x1xf32>
    %531 = arith.mulf %526, %530 : vector<8x1xf32>
    %cst_178 = arith.constant 3.125000e-02 : f32
    %532 = vector.broadcast %cst_178 : f32 to vector<8x1xf32>
    %533 = arith.mulf %529, %532 : vector<8x1xf32>
    %534 = arith.mulf %531, %531 : vector<8x1xf32>
    %535 = arith.subf %533, %534 : vector<8x1xf32>
    %cst_179 = arith.constant 0.000000e+00 : f32
    %536 = vector.broadcast %cst_179 : f32 to vector<8x1xf32>
    %537 = arith.maximumf %535, %536 : vector<8x1xf32>
    %cst_180 = arith.constant 9.99999974E-6 : f32
    %538 = vector.broadcast %cst_180 : f32 to vector<8x1xf32>
    %539 = arith.addf %537, %538 : vector<8x1xf32>
    %540 = math.rsqrt %539 : vector<8x1xf32>
    %541 = vector.broadcast %531 : vector<8x1xf32> to vector<8x128xf32>
    %542 = arith.subf %524, %541 : vector<8x128xf32>
    %543 = vector.broadcast %540 : vector<8x1xf32> to vector<8x128xf32>
    %544 = arith.mulf %542, %543 : vector<8x128xf32>
    %cst_181 = arith.constant 0.000000e+00 : f32
    %545 = vector.shape_cast %2 : vector<1x128xi1> to vector<1x128xi1>
    %546 = vector.broadcast %545 : vector<1x128xi1> to vector<8x128xi1>
    %547 = vector.broadcast %cst_181 : f32 to vector<8x128xf32>
    %548 = arith.select %546, %544, %547 : vector<8x128xi1>, vector<8x128xf32>
    %cst_182 = arith.constant 0.000000e+00 : f32
    %549 = vector.broadcast %cst_182 : f32 to vector<8x128xf32>
    %550 = arith.maximumf %86, %549 : vector<8x128xf32>
    %c1_i32_183 = arith.constant 1 : i32
    %551 = tpu.dynamic_rotate %550 by %c1_i32_183 dim 1 : vector<8x128xf32>, i32 -> vector<8x128xf32>
    %cst_184 = arith.constant 0.000000e+00 : f32
    %552 = vector.shape_cast %21 : vector<1x128xi1> to vector<1x128xi1>
    %553 = vector.broadcast %552 : vector<1x128xi1> to vector<8x128xi1>
    %554 = vector.broadcast %cst_184 : f32 to vector<8x128xf32>
    %555 = arith.select %553, %551, %554 : vector<8x128xi1>, vector<8x128xf32>
    %c127_i32_185 = arith.constant 127 : i32
    %556 = tpu.dynamic_rotate %550 by %c127_i32_185 dim 1 : vector<8x128xf32>, i32 -> vector<8x128xf32>
    %cst_186 = arith.constant 0.000000e+00 : f32
    %557 = vector.shape_cast %24 : vector<1x128xi1> to vector<1x128xi1>
    %558 = vector.broadcast %557 : vector<1x128xi1> to vector<8x128xi1>
    %559 = vector.broadcast %cst_186 : f32 to vector<8x128xf32>
    %560 = arith.select %558, %556, %559 : vector<8x128xi1>, vector<8x128xf32>
    %561 = tpu.concatenate %555, %550, %560 in 0 : vector<8x128xf32>, vector<8x128xf32>, vector<8x128xf32> -> vector<24x128xf32>
    %562 = arith.truncf %476 : vector<8x24xf32> to vector<8x24xbf16>
    %563 = arith.truncf %561 : vector<24x128xf32> to vector<24x128xbf16>
    %cst_187 = arith.constant dense<0.000000e+00> : vector<8x128xf32>
    %564 = tpu.matmul %562, %563, %cst_187 {dimension_numbers = #tpu.dot_dimension_numbers<[1], [0], [0], [1], [0, 0, 1, 1], [], []>} : vector<8x24xbf16>, vector<24x128xbf16>, vector<8x128xf32> -> vector<8x128xf32>
    %cst_188 = arith.constant dense<0.000000e+00> : vector<8xf32>
    %565 = vector.multi_reduction <add>, %564, %cst_188 [1] : vector<8x128xf32> to vector<8xf32>
    %566 = vector.shape_cast %565 : vector<8xf32> to vector<8x1xf32>
    %567 = arith.mulf %564, %564 : vector<8x128xf32>
    %cst_189 = arith.constant dense<0.000000e+00> : vector<8xf32>
    %568 = vector.multi_reduction <add>, %567, %cst_189 [1] : vector<8x128xf32> to vector<8xf32>
    %569 = vector.shape_cast %568 : vector<8xf32> to vector<8x1xf32>
    %cst_190 = arith.constant 3.125000e-02 : f32
    %570 = vector.broadcast %cst_190 : f32 to vector<8x1xf32>
    %571 = arith.mulf %566, %570 : vector<8x1xf32>
    %cst_191 = arith.constant 3.125000e-02 : f32
    %572 = vector.broadcast %cst_191 : f32 to vector<8x1xf32>
    %573 = arith.mulf %569, %572 : vector<8x1xf32>
    %574 = arith.mulf %571, %571 : vector<8x1xf32>
    %575 = arith.subf %573, %574 : vector<8x1xf32>
    %cst_192 = arith.constant 0.000000e+00 : f32
    %576 = vector.broadcast %cst_192 : f32 to vector<8x1xf32>
    %577 = arith.maximumf %575, %576 : vector<8x1xf32>
    %cst_193 = arith.constant 9.99999974E-6 : f32
    %578 = vector.broadcast %cst_193 : f32 to vector<8x1xf32>
    %579 = arith.addf %577, %578 : vector<8x1xf32>
    %580 = math.rsqrt %579 : vector<8x1xf32>
    %581 = vector.broadcast %571 : vector<8x1xf32> to vector<8x128xf32>
    %582 = arith.subf %564, %581 : vector<8x128xf32>
    %583 = vector.broadcast %580 : vector<8x1xf32> to vector<8x128xf32>
    %584 = arith.mulf %582, %583 : vector<8x128xf32>
    %cst_194 = arith.constant 0.000000e+00 : f32
    %585 = vector.shape_cast %2 : vector<1x128xi1> to vector<1x128xi1>
    %586 = vector.broadcast %585 : vector<1x128xi1> to vector<8x128xi1>
    %587 = vector.broadcast %cst_194 : f32 to vector<8x128xf32>
    %588 = arith.select %586, %584, %587 : vector<8x128xi1>, vector<8x128xf32>
    %c3_195 = arith.constant 3 : index
    %c1_196 = arith.constant 1 : index
    %589 = memref.load %arg0[%c3_195, %c1_196] : memref<5x5xf32, #tpu.memory_space<smem>>
    %c3_197 = arith.constant 3 : index
    %c2_198 = arith.constant 2 : index
    %590 = memref.load %arg0[%c3_197, %c2_198] : memref<5x5xf32, #tpu.memory_space<smem>>
    %c3_199 = arith.constant 3 : index
    %c3_200 = arith.constant 3 : index
    %591 = memref.load %arg0[%c3_199, %c3_200] : memref<5x5xf32, #tpu.memory_space<smem>>
    %c3_201 = arith.constant 3 : index
    %c4_202 = arith.constant 4 : index
    %592 = memref.load %arg0[%c3_201, %c4_202] : memref<5x5xf32, #tpu.memory_space<smem>>
    %593 = vector.broadcast %589 : f32 to vector<8x128xf32>
    %594 = arith.mulf %593, %86 : vector<8x128xf32>
    %595 = vector.broadcast %590 : f32 to vector<8x128xf32>
    %596 = arith.mulf %595, %512 : vector<8x128xf32>
    %597 = arith.addf %594, %596 : vector<8x128xf32>
    %598 = vector.broadcast %591 : f32 to vector<8x128xf32>
    %599 = arith.mulf %598, %548 : vector<8x128xf32>
    %600 = arith.addf %597, %599 : vector<8x128xf32>
    %601 = vector.broadcast %592 : f32 to vector<8x128xf32>
    %602 = arith.mulf %601, %588 : vector<8x128xf32>
    %603 = arith.addf %600, %602 : vector<8x128xf32>
    %604 = arith.addf %474, %603 : vector<8x128xf32>
    %c4_203 = arith.constant 4 : index
    %c0_204 = arith.constant 0 : index
    %c0_205 = arith.constant 0 : index
    %605 = vector.load %arg5[%c4_203, %c0_204, %c0_205] : memref<5x8x24xf32, #tpu.memory_space<vmem>>, vector<1x8x24xf32>
    %606 = vector.shape_cast %605 : vector<1x8x24xf32> to vector<8x24xf32>
    %c1_i32_206 = arith.constant 1 : i32
    %607 = tpu.dynamic_rotate %345 by %c1_i32_206 dim 1 : vector<8x128xf32>, i32 -> vector<8x128xf32>
    %c127_i32_207 = arith.constant 127 : i32
    %608 = tpu.dynamic_rotate %345 by %c127_i32_207 dim 1 : vector<8x128xf32>, i32 -> vector<8x128xf32>
    %cst_208 = arith.constant 0xFF800000 : f32
    %609 = vector.shape_cast %21 : vector<1x128xi1> to vector<1x128xi1>
    %610 = vector.broadcast %609 : vector<1x128xi1> to vector<8x128xi1>
    %611 = vector.broadcast %cst_208 : f32 to vector<8x128xf32>
    %612 = arith.select %610, %607, %611 : vector<8x128xi1>, vector<8x128xf32>
    %613 = arith.maximumf %612, %345 : vector<8x128xf32>
    %cst_209 = arith.constant 0xFF800000 : f32
    %614 = vector.shape_cast %24 : vector<1x128xi1> to vector<1x128xi1>
    %615 = vector.broadcast %614 : vector<1x128xi1> to vector<8x128xi1>
    %616 = vector.broadcast %cst_209 : f32 to vector<8x128xf32>
    %617 = arith.select %615, %608, %616 : vector<8x128xi1>, vector<8x128xf32>
    %618 = arith.maximumf %613, %617 : vector<8x128xf32>
    %cst_210 = arith.constant dense<0.000000e+00> : vector<8xf32>
    %619 = vector.multi_reduction <add>, %618, %cst_210 [1] : vector<8x128xf32> to vector<8xf32>
    %620 = vector.shape_cast %619 : vector<8xf32> to vector<8x1xf32>
    %621 = arith.mulf %618, %618 : vector<8x128xf32>
    %cst_211 = arith.constant dense<0.000000e+00> : vector<8xf32>
    %622 = vector.multi_reduction <add>, %621, %cst_211 [1] : vector<8x128xf32> to vector<8xf32>
    %623 = vector.shape_cast %622 : vector<8xf32> to vector<8x1xf32>
    %cst_212 = arith.constant 3.125000e-02 : f32
    %624 = vector.broadcast %cst_212 : f32 to vector<8x1xf32>
    %625 = arith.mulf %620, %624 : vector<8x1xf32>
    %cst_213 = arith.constant 3.125000e-02 : f32
    %626 = vector.broadcast %cst_213 : f32 to vector<8x1xf32>
    %627 = arith.mulf %623, %626 : vector<8x1xf32>
    %628 = arith.mulf %625, %625 : vector<8x1xf32>
    %629 = arith.subf %627, %628 : vector<8x1xf32>
    %cst_214 = arith.constant 0.000000e+00 : f32
    %630 = vector.broadcast %cst_214 : f32 to vector<8x1xf32>
    %631 = arith.maximumf %629, %630 : vector<8x1xf32>
    %cst_215 = arith.constant 9.99999974E-6 : f32
    %632 = vector.broadcast %cst_215 : f32 to vector<8x1xf32>
    %633 = arith.addf %631, %632 : vector<8x1xf32>
    %634 = math.rsqrt %633 : vector<8x1xf32>
    %635 = vector.broadcast %625 : vector<8x1xf32> to vector<8x128xf32>
    %636 = arith.subf %618, %635 : vector<8x128xf32>
    %637 = vector.broadcast %634 : vector<8x1xf32> to vector<8x128xf32>
    %638 = arith.mulf %636, %637 : vector<8x128xf32>
    %cst_216 = arith.constant 0.000000e+00 : f32
    %639 = vector.shape_cast %2 : vector<1x128xi1> to vector<1x128xi1>
    %640 = vector.broadcast %639 : vector<1x128xi1> to vector<8x128xi1>
    %641 = vector.broadcast %cst_216 : f32 to vector<8x128xf32>
    %642 = arith.select %640, %638, %641 : vector<8x128xi1>, vector<8x128xf32>
    %cst_217 = arith.constant 0.000000e+00 : f32
    %643 = vector.shape_cast %21 : vector<1x128xi1> to vector<1x128xi1>
    %644 = vector.broadcast %643 : vector<1x128xi1> to vector<8x128xi1>
    %645 = vector.broadcast %cst_217 : f32 to vector<8x128xf32>
    %646 = arith.select %644, %607, %645 : vector<8x128xi1>, vector<8x128xf32>
    %647 = arith.addf %646, %345 : vector<8x128xf32>
    %cst_218 = arith.constant 0.000000e+00 : f32
    %648 = vector.shape_cast %24 : vector<1x128xi1> to vector<1x128xi1>
    %649 = vector.broadcast %648 : vector<1x128xi1> to vector<8x128xi1>
    %650 = vector.broadcast %cst_218 : f32 to vector<8x128xf32>
    %651 = arith.select %649, %608, %650 : vector<8x128xi1>, vector<8x128xf32>
    %652 = arith.addf %647, %651 : vector<8x128xf32>
    %cst_219 = arith.constant 0.333333343 : f32
    %653 = vector.broadcast %cst_219 : f32 to vector<8x128xf32>
    %654 = arith.mulf %652, %653 : vector<8x128xf32>
    %cst_220 = arith.constant dense<0.000000e+00> : vector<8xf32>
    %655 = vector.multi_reduction <add>, %654, %cst_220 [1] : vector<8x128xf32> to vector<8xf32>
    %656 = vector.shape_cast %655 : vector<8xf32> to vector<8x1xf32>
    %657 = arith.mulf %654, %654 : vector<8x128xf32>
    %cst_221 = arith.constant dense<0.000000e+00> : vector<8xf32>
    %658 = vector.multi_reduction <add>, %657, %cst_221 [1] : vector<8x128xf32> to vector<8xf32>
    %659 = vector.shape_cast %658 : vector<8xf32> to vector<8x1xf32>
    %cst_222 = arith.constant 3.125000e-02 : f32
    %660 = vector.broadcast %cst_222 : f32 to vector<8x1xf32>
    %661 = arith.mulf %656, %660 : vector<8x1xf32>
    %cst_223 = arith.constant 3.125000e-02 : f32
    %662 = vector.broadcast %cst_223 : f32 to vector<8x1xf32>
    %663 = arith.mulf %659, %662 : vector<8x1xf32>
    %664 = arith.mulf %661, %661 : vector<8x1xf32>
    %665 = arith.subf %663, %664 : vector<8x1xf32>
    %cst_224 = arith.constant 0.000000e+00 : f32
    %666 = vector.broadcast %cst_224 : f32 to vector<8x1xf32>
    %667 = arith.maximumf %665, %666 : vector<8x1xf32>
    %cst_225 = arith.constant 9.99999974E-6 : f32
    %668 = vector.broadcast %cst_225 : f32 to vector<8x1xf32>
    %669 = arith.addf %667, %668 : vector<8x1xf32>
    %670 = math.rsqrt %669 : vector<8x1xf32>
    %671 = vector.broadcast %661 : vector<8x1xf32> to vector<8x128xf32>
    %672 = arith.subf %654, %671 : vector<8x128xf32>
    %673 = vector.broadcast %670 : vector<8x1xf32> to vector<8x128xf32>
    %674 = arith.mulf %672, %673 : vector<8x128xf32>
    %cst_226 = arith.constant 0.000000e+00 : f32
    %675 = vector.shape_cast %2 : vector<1x128xi1> to vector<1x128xi1>
    %676 = vector.broadcast %675 : vector<1x128xi1> to vector<8x128xi1>
    %677 = vector.broadcast %cst_226 : f32 to vector<8x128xf32>
    %678 = arith.select %676, %674, %677 : vector<8x128xi1>, vector<8x128xf32>
    %cst_227 = arith.constant 0.000000e+00 : f32
    %679 = vector.broadcast %cst_227 : f32 to vector<8x128xf32>
    %680 = arith.maximumf %345, %679 : vector<8x128xf32>
    %c1_i32_228 = arith.constant 1 : i32
    %681 = tpu.dynamic_rotate %680 by %c1_i32_228 dim 1 : vector<8x128xf32>, i32 -> vector<8x128xf32>
    %cst_229 = arith.constant 0.000000e+00 : f32
    %682 = vector.shape_cast %21 : vector<1x128xi1> to vector<1x128xi1>
    %683 = vector.broadcast %682 : vector<1x128xi1> to vector<8x128xi1>
    %684 = vector.broadcast %cst_229 : f32 to vector<8x128xf32>
    %685 = arith.select %683, %681, %684 : vector<8x128xi1>, vector<8x128xf32>
    %c127_i32_230 = arith.constant 127 : i32
    %686 = tpu.dynamic_rotate %680 by %c127_i32_230 dim 1 : vector<8x128xf32>, i32 -> vector<8x128xf32>
    %cst_231 = arith.constant 0.000000e+00 : f32
    %687 = vector.shape_cast %24 : vector<1x128xi1> to vector<1x128xi1>
    %688 = vector.broadcast %687 : vector<1x128xi1> to vector<8x128xi1>
    %689 = vector.broadcast %cst_231 : f32 to vector<8x128xf32>
    %690 = arith.select %688, %686, %689 : vector<8x128xi1>, vector<8x128xf32>
    %691 = tpu.concatenate %685, %680, %690 in 0 : vector<8x128xf32>, vector<8x128xf32>, vector<8x128xf32> -> vector<24x128xf32>
    %692 = arith.truncf %606 : vector<8x24xf32> to vector<8x24xbf16>
    %693 = arith.truncf %691 : vector<24x128xf32> to vector<24x128xbf16>
    %cst_232 = arith.constant dense<0.000000e+00> : vector<8x128xf32>
    %694 = tpu.matmul %692, %693, %cst_232 {dimension_numbers = #tpu.dot_dimension_numbers<[1], [0], [0], [1], [0, 0, 1, 1], [], []>} : vector<8x24xbf16>, vector<24x128xbf16>, vector<8x128xf32> -> vector<8x128xf32>
    %cst_233 = arith.constant dense<0.000000e+00> : vector<8xf32>
    %695 = vector.multi_reduction <add>, %694, %cst_233 [1] : vector<8x128xf32> to vector<8xf32>
    %696 = vector.shape_cast %695 : vector<8xf32> to vector<8x1xf32>
    %697 = arith.mulf %694, %694 : vector<8x128xf32>
    %cst_234 = arith.constant dense<0.000000e+00> : vector<8xf32>
    %698 = vector.multi_reduction <add>, %697, %cst_234 [1] : vector<8x128xf32> to vector<8xf32>
    %699 = vector.shape_cast %698 : vector<8xf32> to vector<8x1xf32>
    %cst_235 = arith.constant 3.125000e-02 : f32
    %700 = vector.broadcast %cst_235 : f32 to vector<8x1xf32>
    %701 = arith.mulf %696, %700 : vector<8x1xf32>
    %cst_236 = arith.constant 3.125000e-02 : f32
    %702 = vector.broadcast %cst_236 : f32 to vector<8x1xf32>
    %703 = arith.mulf %699, %702 : vector<8x1xf32>
    %704 = arith.mulf %701, %701 : vector<8x1xf32>
    %705 = arith.subf %703, %704 : vector<8x1xf32>
    %cst_237 = arith.constant 0.000000e+00 : f32
    %706 = vector.broadcast %cst_237 : f32 to vector<8x1xf32>
    %707 = arith.maximumf %705, %706 : vector<8x1xf32>
    %cst_238 = arith.constant 9.99999974E-6 : f32
    %708 = vector.broadcast %cst_238 : f32 to vector<8x1xf32>
    %709 = arith.addf %707, %708 : vector<8x1xf32>
    %710 = math.rsqrt %709 : vector<8x1xf32>
    %711 = vector.broadcast %701 : vector<8x1xf32> to vector<8x128xf32>
    %712 = arith.subf %694, %711 : vector<8x128xf32>
    %713 = vector.broadcast %710 : vector<8x1xf32> to vector<8x128xf32>
    %714 = arith.mulf %712, %713 : vector<8x128xf32>
    %cst_239 = arith.constant 0.000000e+00 : f32
    %715 = vector.shape_cast %2 : vector<1x128xi1> to vector<1x128xi1>
    %716 = vector.broadcast %715 : vector<1x128xi1> to vector<8x128xi1>
    %717 = vector.broadcast %cst_239 : f32 to vector<8x128xf32>
    %718 = arith.select %716, %714, %717 : vector<8x128xi1>, vector<8x128xf32>
    %c4_240 = arith.constant 4 : index
    %c1_241 = arith.constant 1 : index
    %719 = memref.load %arg0[%c4_240, %c1_241] : memref<5x5xf32, #tpu.memory_space<smem>>
    %c4_242 = arith.constant 4 : index
    %c2_243 = arith.constant 2 : index
    %720 = memref.load %arg0[%c4_242, %c2_243] : memref<5x5xf32, #tpu.memory_space<smem>>
    %c4_244 = arith.constant 4 : index
    %c3_245 = arith.constant 3 : index
    %721 = memref.load %arg0[%c4_244, %c3_245] : memref<5x5xf32, #tpu.memory_space<smem>>
    %c4_246 = arith.constant 4 : index
    %c4_247 = arith.constant 4 : index
    %722 = memref.load %arg0[%c4_246, %c4_247] : memref<5x5xf32, #tpu.memory_space<smem>>
    %723 = vector.broadcast %719 : f32 to vector<8x128xf32>
    %724 = arith.mulf %723, %345 : vector<8x128xf32>
    %725 = vector.broadcast %720 : f32 to vector<8x128xf32>
    %726 = arith.mulf %725, %642 : vector<8x128xf32>
    %727 = arith.addf %724, %726 : vector<8x128xf32>
    %728 = vector.broadcast %721 : f32 to vector<8x128xf32>
    %729 = arith.mulf %728, %678 : vector<8x128xf32>
    %730 = arith.addf %727, %729 : vector<8x128xf32>
    %731 = vector.broadcast %722 : f32 to vector<8x128xf32>
    %732 = arith.mulf %731, %718 : vector<8x128xf32>
    %733 = arith.addf %730, %732 : vector<8x128xf32>
    %734 = arith.addf %604, %733 : vector<8x128xf32>
    %735 = tpu.concatenate %345, %734 in 0 : vector<8x128xf32>, vector<8x128xf32> -> vector<16x128xf32>
    %c0_248 = arith.constant 0 : index
    %c0_249 = arith.constant 0 : index
    %736 = vector.load %arg6[%c0_248, %c0_249] : memref<16x128xf32, #tpu.memory_space<vmem>>, vector<16x128xf32>
    tpu.vector_store %arg6[%c0_248, %c0_249], %735 {strides = array<i32>} : memref<16x128xf32, #tpu.memory_space<vmem>>, vector<16x128xf32>,
    return
  }
}

</mosaic_0001>

<bundles_post_ra>
// kernel: cell_bread_encoder.1
= control target key start
LH: loop header
LB: loop body
LE: loop exit
PB: predicated region body
PF: predicated region fallthrough
CT: control target
= control target key end

     0   :  { %11 = vsyncpa [#allocation3], 0  ;;  %s1238_s0 = inlined_call_operand.vmem [shape: f32[5,5], index: 0, kind: input, shape index: {}]   ;;  %s1239_s1 = inlined_call_operand.vmem [shape: f32[8,128], index: 1, kind: input, shape index: {}]   ;;  %s1240_s2 = inlined_call_operand.vmem [shape: f32[8,128], index: 2, kind: input, shape index: {}]   ;;  %s1241_s3 = inlined_call_operand.vmem [shape: f32[8,8], index: 3, kind: input, shape index: {}]   ;;  %s1242_s4 = inlined_call_operand.vmem [shape: f32[8,8], index: 4, kind: input, shape index: {}]   ;;  %s1243_s5 = inlined_call_operand.vmem [shape: f32[5,8,24], index: 5, kind: input, shape index: {}]   ;;  %s1244_s6 = inlined_call_operand.vmem [shape: f32[16,128], index: 6, kind: output, shape index: {}]  }
   0x1   :  { %s18_s23 = sshll.u32 %s1238_s0, 4  ;;  %s19_s23 = int_to_ptr.vmem [resolvable:$true] %s18_s23 }
   0x2   :  { %s910_s24 = scalar_lea.vmem %s19_s23, 128  ;;  %p915_p1 = scmp.lt.s32.totalorder %s19_s23, %s19_s23 }
   0x3   :  { %p911_p0 = scmp.ne.s32.totalorder %s19_s23, %s910_s24  ;;  %p916_p2 = scmp.lt.s32.totalorder %s910_s24, %s910_s24 }
   0x5   :  { %p917_p3 = por %p916_p2, %p915_p1 }
   0x7   :  { %p918_p4 = pnand %p917_p3, %p911_p0 }
   0x9   :  { %921 = shalt.err (!%p918_p4)
}
   0xa   :  { %s924_s25 = smov [#allocation2]  }
   0xb   :  { %21 = dma.vmem_to_smem %s19_s23, 128, %s924_s25, [#allocation3]  }
   0xc   :  { %922 = dma.done.wait [#allocation3], 128  }
   0xd   :  { %923 = vsyncadd [#allocation3], 4294967168 }
   0xe   :  { %35 = sfence }
   0xf   :  { %v56_v0 = vld [vmem:[%s1239_s1] sm:$0xff]  ;;  %v925_v2 = vmov 0.0   ;;  %vm65_vm0 = vcmask 1043456   ;;  %vm926_vm1 = vmmov 0   ;;  %vm61_vm2 = vcmask 64512   ;;  %s776_s15 = sld [smem:[#allocation2 + $0x102]] }
  0x10   :  { %v126_v1 = vld [vmem:[%s1240_s2] sm:$0xff]  ;;  %816 = vmatprep.subr.bf16.mxu0 %v925_v2  ;;  %v58_v3 = vmax.f32 %v56_v0, 0.0  ;;  %822 = vmatprep.subr.bf16.mxu1 %v925_v2  ;;  %v37_v39 = vlaneseq  ;;  %vm929_vm8 = vmmov 1   ;;  %vm250_vm10 = vcmask 195584   ;;  %s775_s16 = sld [smem:[#allocation2 + $0x101]]  ;;  %s785_s17 = sld [smem:[#allocation2 + $0x182]] }
  0x11   :  { %v128_v4 = vmax.f32 %v126_v1, 0.0  ;;  %818 = vmatprep.mubr.msk.bf16.mxu0 %vm926_vm1, %v925_v2  ;;  %v57_v5 = vld [vmem:[%s1241_s3] sm:$0xff]  ;;  %824 = vmatprep.mubr.msk.bf16.mxu1 %vm926_vm1, %v925_v2  ;;  %s927_s3 = smov 127   ;;  %s777_s18 = sld [smem:[#allocation2 + $0x103]] }
  0x12   :  { %v127_v6 = vld [vmem:[%s1242_s4] sm:$0xff]  ;;  %v60_v7 = vpack.c.bf16 %v58_v3, %v58_v3  ;;  %v59_v11 = vpack.c.bf16 %v57_v5, %v57_v5  ;;  %v994_v40 = vand.u32 127, %v37_v39  ;;  %s928_s4 = smov 1   ;;  %v779_v39 = vld [vmem:[%s1243_s5 + $0x18] sm:$0xff]  ;;  %s784_s19 = sld [smem:[#allocation2 + $0x181]] }
  0x13   :  { %v130_v8 = vpack.c.bf16 %v128_v4, %v128_v4  ;;  %v129_v12 = vpack.c.bf16 %v127_v6, %v127_v6  ;;  %s786_s20 = sld [smem:[#allocation2 + $0x183]]  ;;  %s758_s21 = sld [smem:[#allocation2 + $0x2]] }
  0x14   :  { %v67_v9 = vsel %vm65_vm0, %v60_v7, 0  ;;  %vm39_vm3 = vcmp.lt.s32.totalorder %v994_v40, 32  ;;  %v44_v52 = vand.u32 15, %v994_v40  ;;  %v192_v7 = vld [vmem:[%s1243_s5] sm:$0xff]  ;;  %s767_s22 = sld [smem:[#allocation2 + $0x82]]  ;;  %s757_s23 = sld [smem:[#allocation2 + $0x1]] }
  0x15   :  { %v135_v10 = vsel %vm65_vm0, %v130_v8, 0  ;;  %817 = vmatpush3.bf16.msra.mxu0 %v67_v9  ;;  %s766_s24 = sld [smem:[#allocation2 + $0x81]]  ;;  %s759_s25 = sld [smem:[#allocation2 + $0x3]] }
  0x16   :  { %823 = vmatpush3.bf16.msra.mxu1 %v135_v10  ;;  %828 = vmatprep.subr.bf16.mxu0 %v925_v2  ;;  %vm52_vm4 = vcmp.ne.s32.totalorder %v44_v52, 0  ;;  %vm54_vm5 = vcmp.ne.s32.totalorder %v44_v52, 15  ;;  %v761_v10 = vld [vmem:[%s1243_s5 + $0x8] sm:$0xff]  ;;  %s768_s26 = sld [smem:[#allocation2 + $0x83]]  ;;  %s760_s27 = sld [smem:[#allocation2 + $0x4]] }
  0x17   :  { %836 = vmatprep.subr.bf16.mxu1 %v925_v2  ;;  %vm1020_vm6 = vmand %vm39_vm3, %vm52_vm4  ;;  %s769_s28 = sld [smem:[#allocation2 + $0x84]]  ;;  %s795_s7 = sld [smem:[#allocation2 + $0x203]] }
  0x18   :  { %819 = vmatmul.mubr.msk.bf16.vlgmr.msra.gmra.mrb[0].mxu0 %vm61_vm2, %v59_v11  ;;  %vm1026_vm7 = vmand %vm39_vm3, %vm54_vm5  ;;  %s778_s2 = sld [smem:[#allocation2 + $0x104]] }
  0x19   :  { %825 = vmatmul.mubr.msk.bf16.vlgmr.msra.gmra.mrb[0].mxu1 %vm61_vm2, %v129_v12  ;;  %832 = vmatprep.mubr.msk.bf16.mxu0 %vm926_vm1, %v925_v2  ;;  %vm1032_vm9 = vmpackc.low %vm929_vm8, %vm1020_vm6  ;;  %s796_s8 = sld [smem:[#allocation2 + $0x204]] }
  0x1a   :  { %840 = vmatprep.mubr.msk.bf16.mxu1 %vm926_vm1, %v925_v2 }
  0xeb   :  { %v103_v13 = vpop.f32.mrb[0].mxu0 }
  0xec   :  { %v171_v14 = vpop.f32.mrb[0].mxu1  ;;  %109 = vadd.xlane.f32.xlu0 %v103_v13  ;;  %v820_v15 = vpop.f32.mrb[1].mxu0  ;;  %v111_v17 = vmul.f32 %v103_v13, %v103_v13 }
  0xed   :  { %v826_v16 = vpop.f32.mrb[1].mxu1  ;;  %v106_v18 = vpop.f32.mrb[2].mxu0  ;;  %v179_v22 = vmul.f32 %v171_v14, %v171_v14 }
  0xee   :  { %v174_v19 = vpop.f32.mrb[2].mxu1  ;;  %112 = vadd.xlane.f32.xlu1 %v111_v17  ;;  %v821_v20 = vpop.f32.mrb[3].mxu0 }
  0xef   :  { %v827_v21 = vpop.f32.mrb[3].mxu1  ;;  %v379_v19 = vpack.c.bf16 %v761_v10, %v761_v10 }
  0xf0   :  { %177 = vadd.xlane.f32.xlu0 %v171_v14 }
  0xf2   :  { %180 = vadd.xlane.f32.xlu1 %v179_v22 }
 0x179   :  { %v110_v23 = vpop.xlane.xlu0 %109 }
 0x17a   :  { %v114_v24 = vmul.f32 0.03125, %v110_v23 }
 0x17b   :  { %v113_v25 = vpop.xlane.xlu1 %112 }
 0x17c   :  { %v116_v26 = vmul.f32 %v114_v24, %v114_v24  ;;  %v115_v27 = vmul.f32 0.03125, %v113_v25  ;;  %v121_v41 = vsub.f32 %v103_v13, %v114_v24 }
 0x17d   :  { %v178_v28 = vpop.xlane.xlu0 %177 }
 0x17e   :  { %v117_v29 = vsub.f32 %v115_v27, %v116_v26  ;;  %v182_v30 = vmul.f32 0.03125, %v178_v28 }
 0x17f   :  { %v181_v31 = vpop.xlane.xlu1 %180 }
 0x180   :  { %v118_v32 = vmax.f32 %v117_v29, 0.0  ;;  %v184_v33 = vmul.f32 %v182_v30, %v182_v30  ;;  %v183_v34 = vmul.f32 0.03125, %v181_v31  ;;  %v189_v44 = vsub.f32 %v171_v14, %v182_v30 }
 0x181   :  { %v247_v14 = vpack.c.bf16 %v192_v7, %v192_v7 }
 0x182   :  { %v119_v35 = vadd.f32 1e-05, %v118_v32  ;;  %v185_v36 = vsub.f32 %v183_v34, %v184_v33 }
 0x184   :  { %884 = vrsqrt.f32 %v119_v35  ;;  %v186_v37 = vmax.f32 %v185_v36, 0.0 }
 0x186   :  { %v187_v38 = vadd.f32 1e-05, %v186_v37  ;;  %v770_v37 = vld [vmem:[%s1243_s5 + $0x10] sm:$0xff] }
 0x188   :  { %886 = vrsqrt.f32 %v187_v38  ;;  %v461_v38 = vpack.c.bf16 %v770_v37, %v770_v37 }
 0x18e   :  { %v885_v42 = vpop.eup %884 }
 0x18f   :  { %v122_v43 = vmul.f32 %v885_v42, %v121_v41  ;;  %v537_v41 = vpack.c.bf16 %v779_v39, %v779_v39 }
 0x191   :  { %v999_v46 = vsel %vm39_vm3, %v122_v43, 0.0 }
 0x192   :  { %v887_v45 = vpop.eup %886  ;;  %v240_v49 = vmax.f32 %v999_v46, 0.0 }
 0x193   :  { %v190_v47 = vmul.f32 %v887_v45, %v189_v44 }
 0x195   :  { %v1003_v48 = vsel %vm39_vm3, %v190_v47, 0.0 }
 0x196   :  { %v372_v50 = vmax.f32 %v1003_v48, 0.0 }
 0x198   :  { %v879_v51 = vpack.i.bf16 %v372_v50, %v240_v49 }
 0x19a   :  { %880 = vrot.lane.b32.xlu1 %v879_v51, %s927_s3  ;;  %875 = vrot.lane.b32.xlu0 %v879_v51, %s928_s4 }
 0x19e   :  { %193 = vrot.lane.b32.xlu1 %v999_v46, %s928_s4  ;;  %195 = vrot.lane.b32.xlu0 %v999_v46, %s927_s3 }
 0x1a2   :  { %329 = vrot.lane.b32.xlu1 %v1003_v48, %s928_s4 }
 0x1a6   :  { %331 = vrot.lane.b32.xlu1 %v1003_v48, %s927_s3 }
 0x20c   :  { %v881_v54 = vpop.permute.xlu1 %880  ;;  %v876_v56 = vpop.permute.xlu0 %875 }
 0x20d   :  { %v883_v57 = vunpack.i.h.bf16 %v881_v54  ;;  %v882_v58 = vunpack.i.l.bf16 %v881_v54  ;;  %v878_v59 = vunpack.i.h.bf16 %v876_v56  ;;  %v877_v60 = vunpack.i.l.bf16 %v876_v56 }
 0x20f   :  { %v246_v62 = vsel %vm1026_vm7, %v882_v58, 0.0  ;;  %v378_v63 = vsel %vm1026_vm7, %v883_v57, 0.0  ;;  %v763_v0 = vpack.c.bf16 %v372_v50, %v878_v59  ;;  %v754_v1 = vpack.c.bf16 %v240_v49, %v877_v60 }
 0x210   :  { %v249_v3 = vpack.c.bf16 %v246_v62, %v246_v62  ;;  %v381_v4 = vpack.c.bf16 %v378_v63, %v378_v63  ;;  %v194_v5 = vpop.permute.xlu1 %193  ;;  %v196_v6 = vpop.permute.xlu0 %195 }
 0x211   :  { %v199_v8 = vsel %vm1020_vm6, %v194_v5, -inf  ;;  %v220_v9 = vsel %vm1020_vm6, %v194_v5, 0.0  ;;  %829 = vmatpush3.bf16.msk.msra.mxu0 %vm1032_vm9, %v754_v1  ;;  %837 = vmatpush3.bf16.msk.msra.mxu1 %vm1032_vm9, %v763_v0  ;;  %v203_v13 = vsel %vm1026_vm7, %v196_v6, -inf  ;;  %v222_v22 = vsel %vm1026_vm7, %v196_v6, 0.0 }
 0x212   :  { %v200_v11 = vmax.f32 %v199_v8, %v999_v46  ;;  %830 = vmatprep.subr.bf16.mxu0 %v925_v2  ;;  %838 = vmatprep.subr.bf16.mxu1 %v925_v2  ;;  %v221_v12 = vadd.f32 %v220_v9, %v999_v46  ;;  %v255_v17 = vsel %vm65_vm0, %v249_v3, 0  ;;  %v386_v18 = vsel %vm65_vm0, %v381_v4, 0 }
 0x214   :  { %v1060_v15 = vmax.f32 %v200_v11, %v203_v13  ;;  %v330_v16 = vpop.permute.xlu1 %329  ;;  %v223_v23 = vadd.f32 %v222_v22, %v221_v12  ;;  %v526_v22 = vstv %s776_s15 }
 0x215   :  { %v333_v20 = vsel %vm1020_vm6, %v330_v16, -inf  ;;  %v352_v21 = vsel %vm1020_vm6, %v330_v16, 0.0  ;;  %831 = vmatpush3.bf16.msra.mxu0 %v255_v17  ;;  %839 = vmatpush3.bf16.msra.mxu1 %v386_v18 }
 0x216   :  { %205 = vadd.xlane.f32.xlu0 %v1060_v15  ;;  %844 = vmatprep.subr.bf16.mxu0 %v925_v2  ;;  %v334_v24 = vmax.f32 %v333_v20, %v1003_v48  ;;  %v353_v25 = vadd.f32 %v352_v21, %v1003_v48  ;;  %v207_v27 = vmul.f32 %v1060_v15, %v1060_v15  ;;  %v1093_v32 = vmul.f32 0.33333334, %v223_v23 }
 0x217   :  { %852 = vmatprep.subr.bf16.mxu1 %v925_v2 }
 0x218   :  { %v332_v26 = vpop.permute.xlu1 %331  ;;  %833 = vmatmul.mubr.msk.bf16.vlgmr.msra.gmra.mrb[4].mxu0 %vm250_vm10, %v247_v14  ;;  %841 = vmatmul.mubr.msk.bf16.vlgmr.msra.gmra.mrb[4].mxu1 %vm250_vm10, %v379_v19  ;;  %v227_v35 = vmul.f32 %v1093_v32, %v1093_v32 }
 0x219   :  { %v335_v28 = vsel %vm1026_vm7, %v332_v26, -inf  ;;  %v354_v29 = vsel %vm1026_vm7, %v332_v26, 0.0  ;;  %845 = vmatpush3.bf16.msk.msra.mxu0 %vm1032_vm9, %v754_v1  ;;  %853 = vmatpush3.bf16.msk.msra.mxu1 %vm1032_vm9, %v763_v0 }
 0x21a   :  { %v1087_v30 = vmax.f32 %v334_v24, %v335_v28  ;;  %v355_v31 = vadd.f32 %v354_v29, %v353_v25  ;;  %208 = vadd.xlane.f32.xlu0 %v207_v27  ;;  %846 = vmatprep.subr.bf16.mxu0 %v925_v2  ;;  %v524_v25 = vstv %s775_s16  ;;  %v602_v28 = vstv %s785_s17 }
 0x21b   :  { %854 = vmatprep.subr.bf16.mxu1 %v925_v2  ;;  %848 = vmatprep.mubr.msk.bf16.mxu0 %vm926_vm1, %v925_v2 }
 0x21c   :  { %337 = vadd.xlane.f32.xlu1 %v1087_v30  ;;  %856 = vmatprep.mubr.msk.bf16.mxu1 %vm926_vm1, %v925_v2  ;;  %v1098_v33 = vmul.f32 0.33333334, %v355_v31  ;;  %v339_v34 = vmul.f32 %v1087_v30, %v1087_v30 }
 0x21d   :  { %847 = vmatpush3.bf16.msra.mxu0 %v255_v17  ;;  %855 = vmatpush3.bf16.msra.mxu1 %v386_v18 }
 0x21e   :  { %225 = vadd.xlane.f32.xlu0 %v1093_v32  ;;  %860 = vmatprep.subr.bf16.mxu0 %v925_v2  ;;  %v359_v36 = vmul.f32 %v1098_v33, %v1098_v33 }
 0x220   :  { %357 = vadd.xlane.f32.xlu1 %v1098_v33  ;;  %849 = vmatmul.mubr.msk.bf16.vlgmr.msra.gmra.mrb[8].mxu0 %vm250_vm10, %v461_v38 }
 0x221   :  { %864 = vmatprep.mubr.msk.bf16.mxu0 %vm926_vm1, %v925_v2  ;;  %857 = vmatmul.mubr.msk.bf16.vlgmr.msra.gmra.mrb[8].mxu1 %vm250_vm10, %v537_v41 }
 0x222   :  { %340 = vadd.xlane.f32.xlu0 %v339_v34  ;;  %v525_v34 = vmul.f32 %v524_v25, %v999_v46 }
 0x226   :  { %228 = vadd.xlane.f32.xlu0 %v227_v35 }
 0x22a   :  { %360 = vadd.xlane.f32.xlu0 %v359_v36  ;;  %v600_v36 = vstv %s784_s19 }
 0x2a3   :  { %v206_v42 = vpop.xlane.xlu0 %205 }
 0x2a4   :  { %v210_v43 = vmul.f32 0.03125, %v206_v42  ;;  %v605_v42 = vstv %s786_s20 }
 0x2a6   :  { %v212_v45 = vmul.f32 %v210_v43, %v210_v43  ;;  %v217_v17 = vsub.f32 %v1060_v15, %v210_v43 }
 0x2a7   :  { %v209_v44 = vpop.xlane.xlu0 %208 }
 0x2a8   :  { %v211_v47 = vmul.f32 0.03125, %v209_v44  ;;  %v601_v44 = vmul.f32 %v600_v36, %v1003_v48  ;;  %v321_v36 = vstv %s759_s25 }
 0x2a9   :  { %v338_v49 = vpop.xlane.xlu1 %337 }
 0x2aa   :  { %v213_v50 = vsub.f32 %v211_v47, %v212_v45  ;;  %v342_v54 = vmul.f32 0.03125, %v338_v49 }
 0x2ab   :  { %v226_v51 = vpop.xlane.xlu0 %225 }
 0x2ac   :  { %v214_v52 = vmax.f32 %v213_v50, 0.0  ;;  %v344_v58 = vmul.f32 %v342_v54, %v342_v54  ;;  %v230_v59 = vmul.f32 0.03125, %v226_v51  ;;  %v349_v20 = vsub.f32 %v1087_v30, %v342_v54 }
 0x2ad   :  { %v358_v62 = vpop.xlane.xlu1 %357  ;;  %v529_v30 = vstv %s777_s18 }
 0x2ae   :  { %v215_v56 = vadd.f32 1e-05, %v214_v52  ;;  %v232_v1 = vmul.f32 %v230_v59, %v230_v59  ;;  %v362_v3 = vmul.f32 0.03125, %v358_v62  ;;  %v237_v15 = vsub.f32 %v1093_v32, %v230_v59 }
 0x2af   :  { %v341_v57 = vpop.xlane.xlu0 %340 }
 0x2b0   :  { %v343_v60 = vmul.f32 0.03125, %v341_v57  ;;  %888 = vrsqrt.f32 %v215_v56  ;;  %v364_v9 = vmul.f32 %v362_v3, %v362_v3  ;;  %v369_v35 = vsub.f32 %v1098_v33, %v362_v3 }
 0x2b2   :  { %v345_v63 = vsub.f32 %v343_v60, %v344_v58 }
 0x2b3   :  { %v229_v0 = vpop.xlane.xlu0 %228 }
 0x2b4   :  { %v346_v4 = vmax.f32 %v345_v63, 0.0  ;;  %v231_v5 = vmul.f32 0.03125, %v229_v0 }
 0x2b6   :  { %v347_v6 = vadd.f32 1e-05, %v346_v4  ;;  %v233_v7 = vsub.f32 %v231_v5, %v232_v1 }
 0x2b7   :  { %v361_v8 = vpop.xlane.xlu0 %360 }
 0x2b8   :  { %890 = vrsqrt.f32 %v347_v6  ;;  %v234_v10 = vmax.f32 %v233_v7, 0.0  ;;  %v363_v11 = vmul.f32 0.03125, %v361_v8 }
 0x2ba   :  { %v235_v12 = vadd.f32 1e-05, %v234_v10  ;;  %v365_v13 = vsub.f32 %v363_v11, %v364_v9  ;;  %v889_v14 = vpop.eup %888 }
 0x2bb   :  { %v218_v19 = vmul.f32 %v889_v14, %v217_v17 }
 0x2bc   :  { %892 = vrsqrt.f32 %v235_v12  ;;  %v366_v16 = vmax.f32 %v365_v13, 0.0 }
 0x2bd   :  { %v1123_v23 = vsel %vm39_vm3, %v218_v19, 0.0 }
 0x2be   :  { %v367_v18 = vadd.f32 1e-05, %v366_v16  ;;  %v527_v27 = vmul.f32 %v526_v22, %v1123_v23 }
 0x2c0   :  { %894 = vrsqrt.f32 %v367_v18  ;;  %v528_v38 = vadd.f32 %v527_v27, %v525_v34  ;;  %v316_v34 = vstv %s757_s23 }
 0x2c2   :  { %v891_v21 = vpop.eup %890 }
 0x2c3   :  { %v350_v24 = vmul.f32 %v891_v21, %v349_v20 }
 0x2c5   :  { %v1129_v29 = vsel %vm39_vm3, %v350_v24, 0.0 }
 0x2c6   :  { %v893_v26 = vpop.eup %892  ;;  %v603_v39 = vmul.f32 %v602_v28, %v1129_v29  ;;  %v318_v28 = vstv %s758_s21 }
 0x2c7   :  { %v238_v31 = vmul.f32 %v893_v26, %v237_v15 }
 0x2c8   :  { %v604_v47 = vadd.f32 %v603_v39, %v601_v44 }
 0x2c9   :  { %v1135_v37 = vsel %vm39_vm3, %v238_v31, 0.0 }
 0x2ca   :  { %v895_v32 = vpop.eup %894  ;;  %v530_v41 = vmul.f32 %v529_v30, %v1135_v37  ;;  %v449_v30 = vstv %s767_s22 }
 0x2cb   :  { %v370_v43 = vmul.f32 %v895_v32, %v369_v35  ;;  %v447_v35 = vstv %s766_s24  ;;  %v452_v32 = vstv %s768_s26  ;;  %v450_v39 = vmul.f32 %v449_v30, %v1129_v29 }
 0x2cc   :  { %v1140_v45 = vadd.f32 %v530_v41, %v528_v38  ;;  %v319_v38 = vmul.f32 %v318_v28, %v1123_v23  ;;  %v324_v41 = vstv %s760_s27 }
 0x2cd   :  { %v1144_v33 = vsel %vm39_vm3, %v370_v43, 0.0 }
 0x2ce   :  { %v606_v49 = vmul.f32 %v605_v42, %v1144_v33 }
 0x2d0   :  { %v1147_v50 = vadd.f32 %v606_v49, %v604_v47  ;;  %v317_v47 = vmul.f32 %v316_v34, %v999_v46  ;;  %v448_v49 = vmul.f32 %v447_v35, %v1003_v48 }
 0x2d2   :  { %v320_v23 = vadd.f32 %v319_v38, %v317_v47 }
 0x2eb   :  { %v291_v51 = vpop.f32.mrb[4].mxu0  ;;  %v1149_v52 = vpop.f32.mrb[4].mxu1 }
 0x2ec   :  { %297 = vadd.xlane.f32.xlu1 %v291_v51  ;;  %v834_v54 = vpop.f32.mrb[5].mxu0  ;;  %v842_v56 = vpop.f32.mrb[5].mxu1  ;;  %v299_v57 = vmul.f32 %v291_v51, %v291_v51  ;;  %v430_v63 = vmul.f32 %v1149_v52, %v1149_v52 }
 0x2ed   :  { %v294_v58 = vpop.f32.mrb[6].mxu0  ;;  %v425_v59 = vpop.f32.mrb[6].mxu1  ;;  %v453_v54 = vmul.f32 %v452_v32, %v1144_v33  ;;  %v455_v56 = vstv %s769_s28 }
 0x2ee   :  { %v835_v60 = vpop.f32.mrb[7].mxu0  ;;  %300 = vadd.xlane.f32.xlu0 %v299_v57  ;;  %v843_v62 = vpop.f32.mrb[7].mxu1  ;;  %v451_v58 = vadd.f32 %v450_v39, %v448_v49 }
 0x2f0   :  { %428 = vadd.xlane.f32.xlu1 %v1149_v52  ;;  %v454_v62 = vadd.f32 %v453_v54, %v451_v58 }
 0x2f3   :  { %v1154_v0 = vpop.f32.mrb[8].mxu0 }
 0x2f4   :  { %431 = vadd.xlane.f32.xlu1 %v430_v63  ;;  %v850_v1 = vpop.f32.mrb[9].mxu0  ;;  %v1156_v5 = vpop.f32.mrb[8].mxu1  ;;  %v507_v33 = vmul.f32 %v1154_v0, %v1154_v0 }
 0x2f5   :  { %v502_v3 = vpop.f32.mrb[10].mxu0  ;;  %v858_v6 = vpop.f32.mrb[9].mxu1 }
 0x2f6   :  { %v851_v4 = vpop.f32.mrb[11].mxu0  ;;  %v578_v7 = vpop.f32.mrb[10].mxu1 }
 0x2f7   :  { %v859_v8 = vpop.f32.mrb[11].mxu1 }
 0x379   :  { %v298_v9 = vpop.xlane.xlu1 %297 }
 0x37a   :  { %v302_v10 = vmul.f32 0.03125, %v298_v9  ;;  %v788_v9 = vld [vmem:[%s1243_s5 + $0x20] sm:$0xff]  ;;  %s787_s5 = sld [smem:[#allocation2 + $0x184]] }
 0x37b   :  { %v301_v11 = vpop.xlane.xlu0 %300 }
 0x37c   :  { %v304_v12 = vmul.f32 %v302_v10, %v302_v10  ;;  %v303_v13 = vmul.f32 0.03125, %v301_v11  ;;  %v309_v26 = vsub.f32 %v291_v51, %v302_v10  ;;  %v322_v51 = vmul.f32 %v321_v36, %v1135_v37 }
 0x37d   :  { %v429_v14 = vpop.xlane.xlu1 %428  ;;  %v583_v37 = vmul.f32 %v1156_v5, %v1156_v5 }
 0x37e   :  { %v305_v16 = vsub.f32 %v303_v13, %v304_v12  ;;  %v433_v17 = vmul.f32 0.03125, %v429_v14  ;;  %v323_v60 = vadd.f32 %v322_v51, %v320_v23  ;;  %v664_v14 = vpack.c.bf16 %v788_v9, %v788_v9 }
 0x37f   :  { %v532_v23 = vstv %s778_s2 }
 0x380   :  { %v306_v18 = vmax.f32 %v305_v16, 0.0  ;;  %v435_v21 = vmul.f32 %v433_v17, %v433_v17  ;;  %v440_v43 = vsub.f32 %v1149_v52, %v433_v17 }
 0x381   :  { %v432_v19 = vpop.xlane.xlu1 %431 }
 0x382   :  { %v307_v20 = vadd.f32 1e-05, %v306_v18  ;;  %v434_v22 = vmul.f32 0.03125, %v432_v19 }
 0x384   :  { %896 = vrsqrt.f32 %v307_v20  ;;  %v436_v24 = vsub.f32 %v434_v22, %v435_v21 }
 0x386   :  { %v437_v25 = vmax.f32 %v436_v24, 0.0 }
 0x388   :  { %v438_v15 = vadd.f32 1e-05, %v437_v25 }
 0x38a   :  { %898 = vrsqrt.f32 %v438_v15 }
 0x38e   :  { %v897_v27 = vpop.eup %896 }
 0x38f   :  { %v310_v31 = vmul.f32 %v897_v27, %v309_v26 }
 0x391   :  { %v311_v42 = vsel %vm39_vm3, %v310_v31, 0.0 }
 0x392   :  { %v325_v29 = vmul.f32 %v324_v41, %v311_v42 }
 0x394   :  { %v899_v44 = vpop.eup %898  ;;  %v326_v63 = vadd.f32 %v325_v29, %v323_v60 }
 0x395   :  { %v441_v57 = vmul.f32 %v899_v44, %v440_v43  ;;  %v608_v44 = vstv %s787_s5 }
 0x397   :  { %v442_v59 = vsel %vm39_vm3, %v441_v57, 0.0 }
 0x398   :  { %v456_v52 = vmul.f32 %v455_v56, %v442_v59 }
 0x39a   :  { %v457_v1 = vadd.f32 %v456_v52, %v454_v62 }
 0x39c   :  { %v1169_v46 = vadd.f32 %v457_v1, %v326_v63 }
 0x39e   :  { %744 = vst [vmem:[%s1244_s6] sm:$0xff] %v1169_v46  ;;  %v657_v48 = vmax.f32 %v1169_v46, 0.0 }
 0x3a0   :  { %661 = vrot.lane.b32.xlu1 %v657_v48, %s927_s3  ;;  %658 = vrot.lane.b32.xlu0 %v657_v48, %s928_s4 }
 0x3a4   :  { %614 = vrot.lane.b32.xlu1 %v1169_v46, %s928_s4  ;;  %s793_s4 = sld [smem:[#allocation2 + $0x201]] }
 0x3a8   :  { %616 = vrot.lane.b32.xlu1 %v1169_v46, %s927_s3  ;;  %s794_s3 = sld [smem:[#allocation2 + $0x202]] }
 0x3bf   :  { %505 = vadd.xlane.f32.xlu0 %v1154_v0 }
 0x3c3   :  { %581 = vadd.xlane.f32.xlu0 %v1156_v5 }
 0x3c7   :  { %584 = vadd.xlane.f32.xlu0 %v583_v37 }
 0x3cc   :  { %508 = vadd.xlane.f32.xlu1 %v507_v33 }
 0x412   :  { %v662_v3 = vpop.permute.xlu1 %661  ;;  %v659_v4 = vpop.permute.xlu0 %658 }
 0x413   :  { %v663_v6 = vsel %vm1026_vm7, %v662_v3, 0.0  ;;  %v790_v7 = vpack.c.bf16 %v657_v48, %v659_v4 }
 0x414   :  { %v666_v8 = vpack.c.bf16 %v663_v6, %v663_v6 }
 0x415   :  { %861 = vmatpush3.bf16.msk.msra.mxu0 %vm1032_vm9, %v790_v7 }
 0x416   :  { %v615_v10 = vpop.permute.xlu1 %614  ;;  %862 = vmatprep.subr.bf16.mxu0 %v925_v2  ;;  %v671_v13 = vsel %vm65_vm0, %v666_v8, 0 }
 0x417   :  { %v618_v11 = vsel %vm1020_vm6, %v615_v10, -inf  ;;  %v637_v12 = vsel %vm1020_vm6, %v615_v10, 0.0 }
 0x418   :  { %v619_v61 = vmax.f32 %v618_v11, %v1169_v46  ;;  %v638_v16 = vadd.f32 %v637_v12, %v1169_v46 }
 0x419   :  { %863 = vmatpush3.bf16.msra.mxu0 %v671_v13 }
 0x41a   :  { %v617_v17 = vpop.permute.xlu1 %616 }
 0x41b   :  { %v620_v18 = vsel %vm1026_vm7, %v617_v17, -inf  ;;  %v639_v2 = vsel %vm1026_vm7, %v617_v17, 0.0 }
 0x41c   :  { %v1207_v19 = vmax.f32 %v619_v61, %v620_v18  ;;  %v640_v20 = vadd.f32 %v639_v2, %v638_v16  ;;  %865 = vmatmul.mubr.msk.bf16.vlgmr.msra.gmra.mrb[12].mxu0 %vm250_vm10, %v664_v14 }
 0x41e   :  { %v1210_v53 = vmul.f32 0.33333334, %v640_v20  ;;  %622 = vadd.xlane.f32.xlu0 %v1207_v19  ;;  %v624_v21 = vmul.f32 %v1207_v19, %v1207_v19 }
 0x420   :  { %642 = vadd.xlane.f32.xlu1 %v1210_v53  ;;  %v644_v22 = vmul.f32 %v1210_v53, %v1210_v53 }
 0x422   :  { %625 = vadd.xlane.f32.xlu0 %v624_v21 }
 0x424   :  { %645 = vadd.xlane.f32.xlu1 %v644_v22 }
 0x44c   :  { %v506_v55 = vpop.xlane.xlu0 %505 }
 0x44d   :  { %v510_v26 = vmul.f32 0.03125, %v506_v55 }
 0x44f   :  { %v512_v31 = vmul.f32 %v510_v26, %v510_v26  ;;  %v517_v49 = vsub.f32 %v1154_v0, %v510_v26 }
 0x450   :  { %v582_v24 = vpop.xlane.xlu0 %581 }
 0x451   :  { %v586_v25 = vmul.f32 0.03125, %v582_v24 }
 0x453   :  { %v588_v15 = vmul.f32 %v586_v25, %v586_v25  ;;  %v593_v42 = vsub.f32 %v1156_v5, %v586_v25 }
 0x454   :  { %v585_v27 = vpop.xlane.xlu0 %584 }
 0x455   :  { %v587_v28 = vmul.f32 0.03125, %v585_v27  ;;  %v734_v27 = vstv %s794_s3 }
 0x457   :  { %v589_v30 = vsub.f32 %v587_v28, %v588_v15 }
 0x459   :  { %v590_v34 = vmax.f32 %v589_v30, 0.0  ;;  %v509_v35 = vpop.xlane.xlu1 %508 }
 0x45a   :  { %v511_v36 = vmul.f32 0.03125, %v509_v35  ;;  %v737_v35 = vstv %s795_s7 }
 0x45b   :  { %v591_v32 = vadd.f32 1e-05, %v590_v34 }
 0x45c   :  { %v513_v38 = vsub.f32 %v511_v36, %v512_v31  ;;  %v732_v31 = vstv %s793_s4 }
 0x45d   :  { %900 = vrsqrt.f32 %v591_v32  ;;  %v733_v36 = vmul.f32 %v732_v31, %v1169_v46 }
 0x45e   :  { %v514_v39 = vmax.f32 %v513_v38, 0.0 }
 0x460   :  { %v515_v41 = vadd.f32 1e-05, %v514_v39 }
 0x462   :  { %902 = vrsqrt.f32 %v515_v41 }
 0x467   :  { %v901_v43 = vpop.eup %900 }
 0x468   :  { %v594_v47 = vmul.f32 %v901_v43, %v593_v42  ;;  %v740_v42 = vstv %s796_s8 }
 0x46a   :  { %v595_v51 = vsel %vm39_vm3, %v594_v47, 0.0 }
 0x46b   :  { %v609_v54 = vmul.f32 %v608_v44, %v595_v51 }
 0x46c   :  { %v903_v56 = vpop.eup %902 }
 0x46d   :  { %v610_v57 = vadd.f32 %v609_v54, %v1147_v50  ;;  %v518_v58 = vmul.f32 %v903_v56, %v517_v49 }
 0x46f   :  { %v519_v29 = vsel %vm39_vm3, %v518_v58, 0.0 }
 0x470   :  { %v533_v59 = vmul.f32 %v532_v23, %v519_v29 }
 0x472   :  { %v534_v5 = vadd.f32 %v533_v59, %v1140_v45 }
 0x474   :  { %v611_v60 = vadd.f32 %v610_v57, %v534_v5 }
 0x4ab   :  { %v623_v48 = vpop.xlane.xlu0 %622 }
 0x4ac   :  { %v627_v50 = vmul.f32 0.03125, %v623_v48 }
 0x4ad   :  { %v643_v37 = vpop.xlane.xlu1 %642 }
 0x4ae   :  { %v629_v6 = vmul.f32 %v627_v50, %v627_v50  ;;  %v647_v7 = vmul.f32 0.03125, %v643_v37  ;;  %v634_v55 = vsub.f32 %v1207_v19, %v627_v50 }
 0x4af   :  { %v626_v33 = vpop.xlane.xlu0 %625 }
 0x4b0   :  { %v628_v3 = vmul.f32 0.03125, %v626_v33  ;;  %v649_v10 = vmul.f32 %v647_v7, %v647_v7  ;;  %v654_v26 = vsub.f32 %v1210_v53, %v647_v7 }
 0x4b1   :  { %v646_v4 = vpop.xlane.xlu1 %645 }
 0x4b2   :  { %v630_v8 = vsub.f32 %v628_v3, %v629_v6  ;;  %v648_v9 = vmul.f32 0.03125, %v646_v4 }
 0x4b4   :  { %v631_v45 = vmax.f32 %v630_v8, 0.0  ;;  %v650_v11 = vsub.f32 %v648_v9, %v649_v10 }
 0x4b6   :  { %v632_v12 = vadd.f32 1e-05, %v631_v45  ;;  %v651_v13 = vmax.f32 %v650_v11, 0.0 }
 0x4b8   :  { %904 = vrsqrt.f32 %v632_v12  ;;  %v652_v14 = vadd.f32 1e-05, %v651_v13 }
 0x4ba   :  { %906 = vrsqrt.f32 %v652_v14 }
 0x4c2   :  { %v905_v21 = vpop.eup %904 }
 0x4c3   :  { %v635_v25 = vmul.f32 %v905_v21, %v634_v55 }
 0x4c4   :  { %v907_v15 = vpop.eup %906 }
 0x4c5   :  { %v636_v28 = vsel %vm39_vm3, %v635_v25, 0.0  ;;  %v655_v30 = vmul.f32 %v907_v15, %v654_v26 }
 0x4c6   :  { %v735_v34 = vmul.f32 %v734_v27, %v636_v28 }
 0x4c7   :  { %v656_v19 = vsel %vm39_vm3, %v655_v30, 0.0 }
 0x4c8   :  { %v736_v39 = vadd.f32 %v735_v34, %v733_v36  ;;  %v738_v41 = vmul.f32 %v737_v35, %v656_v19 }
 0x4ca   :  { %v739_v44 = vadd.f32 %v738_v41, %v736_v39 }
 0x4ef   :  { %v707_v62 = vpop.f32.mrb[12].mxu0 }
 0x4f0   :  { %713 = vadd.xlane.f32.xlu0 %v707_v62  ;;  %v866_v52 = vpop.f32.mrb[13].mxu0  ;;  %v715_v0 = vmul.f32 %v707_v62, %v707_v62 }
 0x4f1   :  { %v710_v63 = vpop.f32.mrb[14].mxu0 }
 0x4f2   :  { %716 = vadd.xlane.f32.xlu1 %v715_v0  ;;  %v867_v1 = vpop.f32.mrb[15].mxu0 }
 0x57d   :  { %v714_v61 = vpop.xlane.xlu0 %713 }
 0x57e   :  { %v718_v16 = vmul.f32 0.03125, %v714_v61 }
 0x57f   :  { %v717_v17 = vpop.xlane.xlu1 %716 }
 0x580   :  { %v720_v18 = vmul.f32 %v718_v16, %v718_v16  ;;  %v719_v2 = vmul.f32 0.03125, %v717_v17  ;;  %v725_v32 = vsub.f32 %v707_v62, %v718_v16 }
 0x582   :  { %v721_v20 = vsub.f32 %v719_v2, %v720_v18 }
 0x584   :  { %v722_v22 = vmax.f32 %v721_v20, 0.0 }
 0x586   :  { %v723_v24 = vadd.f32 1e-05, %v722_v22 }
 0x588   :  { %908 = vrsqrt.f32 %v723_v24 }
 0x592   :  { %v909_v38 = vpop.eup %908 }
 0x593   :  { %v726_v53 = vmul.f32 %v909_v38, %v725_v32 }
 0x595   :  { %v727_v43 = vsel %vm39_vm3, %v726_v53, 0.0 }
 0x596   :  { %v741_v47 = vmul.f32 %v740_v42, %v727_v43 }
 0x598   :  { %v742_v49 = vadd.f32 %v741_v47, %v739_v44 }
 0x59a   :  { %v743_v51 = vadd.f32 %v742_v49, %v611_v60 }
 0x59c   :  { %745 = vst [vmem:[%s1244_s6 + $0x8] sm:$0xff] %v743_v51 }
 0x59d   :  { %750 = vsyncpa [#allocation3], 1 }

</bundles_post_ra>
